<compile_context>
chip_gen: v7x
topology: tpu7x:2x2x1
jax: 0.10.0
libtpu: 0.0.40
codegen_flags: <defaults>
</compile_context>

<pallas_src>
import functools

import jax
import jax.numpy as jnp
from jax.experimental import pallas as pl
from jax.experimental.pallas import tpu as pltpu

EPS = 1e-5


# ----------------------------------------------------------------------------
# In-kernel helpers
# ----------------------------------------------------------------------------
def _conv3x3_flat(x_flat, w_flat, buf_ref, img_w):
    """3x3 SAME conv in channels-major, spatially-flattened layout.

    x_flat : (Cin, H*W) f32  -- channels on sublanes, flat spatial on lanes.
    w_flat : (Cout, 9*Cin)   -- taps row-major (ky, kx), Cin fastest.
    buf_ref: VMEM scratch (Cin, H*W + 2*(W+1)) used as a zero-padded staging row.
    Returns (Cout, H*W) f32.
    """
    c_in, hw = x_flat.shape
    pad = img_w + 1

    # Zero only the halo pads; the interior is fully overwritten right below.
    # Row (oy) overflow lands in the zero pads; column (ox) overflow is masked.
    buf_ref[:, :pad] = jnp.zeros((c_in, pad), buf_ref.dtype)
    buf_ref[:, pad + hw:] = jnp.zeros((c_in, pad), buf_ref.dtype)
    buf_ref[:, pad:pad + hw] = x_flat

    # Hoisted column-boundary masks, reused by the three ox=-1 / ox=+1 taps.
    col = jax.lax.broadcasted_iota(jnp.int32, (1, hw), 1) % img_w
    not_left = col >= 1                 # valid lanes for ox = -1 taps
    not_right = col <= img_w - 2        # valid lanes for ox = +1 taps

    taps = []
    for oy in (-1, 0, 1):
        for ox in (-1, 0, 1):
            start = pad + oy * img_w + ox          # static lane slice
            sl = buf_ref[:, start:start + hw]      # (Cin, HW)
            if ox == -1:
                sl = jnp.where(not_left, sl, 0.0)
            elif ox == 1:
                sl = jnp.where(not_right, sl, 0.0)
            taps.append(sl)
    patches = jnp.concatenate(taps, axis=0)        # (9*Cin, HW) im2col

    # Single MXU contraction: (Cout, 9*Cin) @ (9*Cin, HW).
    return jax.lax.dot_general(
        w_flat, patches,
        dimension_numbers=(((1,), (0,)), ((), ())),
        preferred_element_type=jnp.float32)


def _adain_relu(y, bias, mean_p, std_p):
    """conv bias + per-(sample, channel) instance norm (biased var, eps under
    sqrt == F.batch_norm training semantics) + AdaIN affine + ReLU.

    y: (C, HW); bias/mean_p/std_p: (C, 1).
    """
    y = y + bias
    mu = jnp.mean(y, axis=1, keepdims=True)
    var = jnp.mean((y - mu) ** 2, axis=1, keepdims=True)
    out = (y - mu) * jax.lax.rsqrt(var + EPS)
    out = out * std_p + mean_p
    return jnp.maximum(out, 0.0)


def _vgg_dec_kernel(x_ref, w0_ref, w1_ref, up_ref, aff_ref, o_ref,
                    buf0_ref, buf1_ref, *, w_l0, w_l1):
    """Fused decoder forward for one batch element.

    x_ref  : (1, Cin0, H*W)           input (NCHW flattened), f32
    w0_ref : (Cout0, 9*Cin0)          conv_0 weight (im2col layout)
    w1_ref : (Cout1, 9*Cout0)         conv_1 weight (im2col layout)
    up_ref : (H*W, 4*H*W)             0/1 nearest-2x expansion matrix
    aff_ref: (1, Cout0+Cout1, 3)      per-sample [conv bias | adain mean | adain std]
    o_ref  : (1, Cout1, 4*H*W)        output (NCHW flattened)
    """
    c0 = w0_ref.shape[0]
    c1 = w1_ref.shape[0]

    x0 = x_ref[0]                                            # (Cin0, HW)
    aff = aff_ref[0]                                         # (c0+c1, 3)

    # ---- conv_0 + ain_0 + relu_0 ----
    y0 = _conv3x3_flat(x0, w0_ref[...], buf0_ref, w_l0)      # (c0, HW)
    y0 = _adain_relu(y0, aff[0:c0, 0:1], aff[0:c0, 1:2], aff[0:c0, 2:3])

    # ---- unpool_0: nearest 2x via 0/1 expansion matmul (stays lane-dense) ----
    y1 = jax.lax.dot_general(
        y0, up_ref[...],
        dimension_numbers=(((1,), (0,)), ((), ())),
        preferred_element_type=jnp.float32)                  # (c0, 4*HW)

    # ---- conv_1 + ain_1 + relu_1 ----
    y2 = _conv3x3_flat(y1, w1_ref[...], buf1_ref, w_l1)      # (c1, 4*HW)
    y2 = _adain_relu(y2, aff[c0:c0 + c1, 0:1], aff[c0:c0 + c1, 1:2],
                     aff[c0:c0 + c1, 2:3])

    o_ref[0] = y2.astype(o_ref.dtype)                        # lane-dense store


# ----------------------------------------------------------------------------
# Host-side wrapper
# ----------------------------------------------------------------------------
def make_upsample_matrix(h, w):
    """(H*W, 4*H*W) 0/1 matrix U with flat_up = flat @ U (nearest, scale 2)."""
    dst = jnp.arange(4 * h * w)
    y_src = (dst // (2 * w)) // 2
    x_src = (dst % (2 * w)) // 2
    src = y_src * w + x_src
    return (jnp.arange(h * w)[:, None] == src[None, :]).astype(jnp.float32)


def apply_adain(adain):
    """VGG_Dec.apply_adain slicing for filter_per_layer=[3, 8] (after reverse)."""
    mean3, std3 = adain[:, 0:3], adain[:, 3:6]
    mean8, std8 = adain[:, 6:14], adain[:, 14:22]
    # After the reversal inside apply_adain: ain_0 (8ch) first, ain_1 (3ch) second.
    return [(mean8, std8), (mean3, std3)]


def pack_affine(adain, b0, b1):
    """Pack conv bias / AdaIN mean / AdaIN std into one (B, C0+C1, 3) array."""
    (m0, s0), (m1, s1) = apply_adain(adain)
    bsz = adain.shape[0]
    bias = jnp.concatenate(
        [jnp.broadcast_to(b0[None, :], (bsz, b0.shape[0])),
         jnp.broadcast_to(b1[None, :], (bsz, b1.shape[0]))], axis=1)
    mean = jnp.concatenate([m0, m1], axis=1)
    std = jnp.concatenate([s0, s1], axis=1)
    return jnp.stack([bias, mean, std], axis=2).astype(jnp.float32)


@jax.jit
def vgg_dec_forward(x_nchw, adain, w0_k, b0, w1_k, b1, up_mat):
    """Forward pass of VGG_Dec.  x_nchw: (B, 16, H, W), adain: (B, 22)."""
    bsz, cin0, h_in, w_in = x_nchw.shape
    hw0 = h_in * w_in
    hw1 = 4 * hw0
    cout0 = w0_k.shape[0]
    cout1 = w1_k.shape[0]

    x_flat = x_nchw.reshape(bsz, cin0, hw0).astype(jnp.float32)  # free reshape
    aff = pack_affine(adain, b0, b1)                              # (B, 11, 3)

    kernel = functools.partial(_vgg_dec_kernel, w_l0=w_in, w_l1=2 * w_in)
    out_flat = pl.pallas_call(
        kernel,
        out_shape=jax.ShapeDtypeStruct((bsz, cout1, hw1), jnp.float32),
        grid_spec=pltpu.PrefetchScalarGridSpec(
            num_scalar_prefetch=0,
            grid=(bsz,),
            in_specs=[
                pl.BlockSpec((1, cin0, hw0), lambda b: (b, 0, 0)),
                pl.BlockSpec((cout0, 9 * cin0), lambda b: (0, 0)),
                pl.BlockSpec((cout1, 9 * cout0), lambda b: (0, 0)),
                pl.BlockSpec((hw0, hw1), lambda b: (0, 0)),
                pl.BlockSpec((1, cout0 + cout1, 3), lambda b: (b, 0, 0)),
            ],
            out_specs=pl.BlockSpec((1, cout1, hw1), lambda b: (b, 0, 0)),
            scratch_shapes=[
                pltpu.VMEM((cin0, hw0 + 2 * w_in + 2), jnp.float32),
                pltpu.VMEM((cout0, hw1 + 4 * w_in + 2), jnp.float32),
            ]),
        compiler_params=pltpu.CompilerParams(
            dimension_semantics=("parallel",)),
    )(x_flat, w0_k, w1_k, up_mat, aff)

    return out_flat.reshape(bsz, cout1, 2 * h_in, 2 * w_in)


# ----------------------------------------------------------------------------
# Parameters / pure-JAX reference
# ----------------------------------------------------------------------------
def init_params(key):
    """Deterministic synthetic weights (shapes per the derived decoder)."""
    k0, k1, k2, k3 = jax.random.split(key, 4)
    w0_hwio = jax.random.normal(k0, (3, 3, 16, 8), jnp.float32) * 0.1  # conv_0: 16->8
    b0 = jax.random.normal(k1, (8,), jnp.float32) * 0.1
    w1_hwio = jax.random.normal(k2, (3, 3, 8, 3), jnp.float32) * 0.1   # conv_1: 8->3
    b1 = jax.random.normal(k3, (3,), jnp.float32) * 0.1

    def to_kernel(w_hwio):
        # (ky, kx, ci, co) -> (co, ky, kx, ci) -> (co, 9*ci)  [im2col weight layout]
        co = w_hwio.shape[3]
        return jnp.transpose(w_hwio, (3, 0, 1, 2)).reshape(co, -1)

    return {"w0_hwio": w0_hwio, "b0": b0, "w1_hwio": w1_hwio, "b1": b1,
            "w0_k": to_kernel(w0_hwio), "w1_k": to_kernel(w1_hwio)}


def upsample2x_nhwc(x):
    b, h, w, c = x.shape
    x = jnp.broadcast_to(x[:, :, None, :, None, :], (b, h, 2, w, 2, c))
    return x.reshape(b, 2 * h, 2 * w, c)


def ref_forward(x_nchw, adain, params):
    """Pure-JAX reference for verification (matches the PyTorch module)."""
    def conv(x, w_hwio, b):
        y = jax.lax.conv_general_dilated(
            x, w_hwio, (1, 1), "SAME",
            dimension_numbers=("NHWC", "HWIO", "NHWC"),
            precision=jax.lax.Precision.HIGHEST)
        return y + b

    def ain_relu(y, mean_p, std_p):
        mu = jnp.mean(y, axis=(1, 2), keepdims=True)
        var = jnp.mean((y - mu) ** 2, axis=(1, 2), keepdims=True)
        out = (y - mu) / jnp.sqrt(var + EPS)
        out = out * std_p[:, None, None, :] + mean_p[:, None, None, :]
        return jnp.maximum(out, 0.0)

    (m0, s0), (m1, s1) = apply_adain(adain)
    x = jnp.transpose(x_nchw, (0, 2, 3, 1))
    x = ain_relu(conv(x, params["w0_hwio"], params["b0"]), m0, s0)
    x = upsample2x_nhwc(x)
    x = ain_relu(conv(x, params["w1_hwio"], params["b1"]), m1, s1)
    return jnp.transpose(x, (0, 3, 1, 2))


if __name__ == "__main__":
    key = jax.random.PRNGKey(0)
    kx, ka, kp = jax.random.split(key, 3)

    B, C_in, H, W = 2, 16, 16, 16
    x = jax.random.normal(kx, (B, C_in, H, W), jnp.float32)          # NCHW input
    adain = jax.random.normal(ka, (B, 2 * 3 + 2 * 8), jnp.float32)   # (B, 22)
    params = init_params(kp)
    up_mat = make_upsample_matrix(H, W)                              # (256, 1024)

    out = vgg_dec_forward(x, adain, params["w0_k"], params["b0"],
                          params["w1_k"], params["b1"], up_mat)
    out = jax.block_until_ready(out)

    ref = jax.block_until_ready(ref_forward(x, adain, params))
    assert out.shape == (B, 3, 2 * H, 2 * W), out.shape
    err = float(jnp.max(jnp.abs(out - ref)))
    assert jnp.allclose(out, ref, atol=1e-3, rtol=1e-3), f"mismatch vs reference: {err}"

    print("KERNEL_OK")
</pallas_src>

<mosaic_0001>
module attributes {stable_mosaic.version = 11 : i64} {
  func.func @_vgg_dec_kernel(%arg0: i32, %arg1: memref<1x16x256xf32, #tpu.memory_space<vmem>>, %arg2: memref<8x144xf32, #tpu.memory_space<vmem>>, %arg3: memref<3x72xf32, #tpu.memory_space<vmem>>, %arg4: memref<256x1024xf32, #tpu.memory_space<vmem>>, %arg5: memref<1x11x3xf32, #tpu.memory_space<vmem>>, %arg6: memref<1x3x1024xf32, #tpu.memory_space<vmem>>, %arg7: memref<16x290xf32, #tpu.memory_space<vmem>>, %arg8: memref<8x1090xf32, #tpu.memory_space<vmem>>) attributes {dimension_semantics = [#tpu.dimension_semantics<parallel>], iteration_bounds = array<i64: 2>, scalar_prefetch = 0 : i64, scratch_operands = 2 : i64, tpu.core_type = #tpu.core_type<tc>, window_params = [{transform_indices = @transform_0, window_bounds = array<i64: 1, 16, 256>}, {pipeline_mode = #tpu.pipeline_mode<synchronous>, transform_indices = @transform_1, window_bounds = array<i64: 8, 144>}, {pipeline_mode = #tpu.pipeline_mode<synchronous>, transform_indices = @transform_2, window_bounds = array<i64: 3, 72>}, {pipeline_mode = #tpu.pipeline_mode<synchronous>, transform_indices = @transform_3, window_bounds = array<i64: 256, 1024>}, {transform_indices = @transform_4, window_bounds = array<i64: 1, 11, 3>}, {transform_indices = @transform_5, window_bounds = array<i64: 1, 3, 1024>}]} {
    %c0 = arith.constant 0 : index
    %c0_0 = arith.constant 0 : index
    %c0_1 = arith.constant 0 : index
    %0 = vector.load %arg1[%c0, %c0_0, %c0_1] : memref<1x16x256xf32, #tpu.memory_space<vmem>>, vector<1x16x256xf32>
    %1 = vector.shape_cast %0 : vector<1x16x256xf32> to vector<16x256xf32>
    %c0_2 = arith.constant 0 : index
    %c0_3 = arith.constant 0 : index
    %c0_4 = arith.constant 0 : index
    %2 = vector.load %arg5[%c0_2, %c0_3, %c0_4] : memref<1x11x3xf32, #tpu.memory_space<vmem>>, vector<1x11x3xf32>
    %3 = vector.shape_cast %2 : vector<1x11x3xf32> to vector<11x3xf32>
    %c0_5 = arith.constant 0 : index
    %c0_6 = arith.constant 0 : index
    %4 = vector.load %arg2[%c0_5, %c0_6] : memref<8x144xf32, #tpu.memory_space<vmem>>, vector<8x144xf32>
    %cst = arith.constant 0.000000e+00 : f32
    %5 = vector.broadcast %cst : f32 to vector<16x17xf32>
    %c0_7 = arith.constant 0 : index
    %c0_8 = arith.constant 0 : index
    %6 = vector.load %arg7[%c0_7, %c0_8] : memref<16x290xf32, #tpu.memory_space<vmem>>, vector<16x17xf32>
    tpu.vector_store %arg7[%c0_7, %c0_8], %5 {strides = array<i32>} : memref<16x290xf32, #tpu.memory_space<vmem>>, vector<16x17xf32>,
    %cst_9 = arith.constant 0.000000e+00 : f32
    %7 = vector.broadcast %cst_9 : f32 to vector<16x17xf32>
    %c0_10 = arith.constant 0 : index
    %c273 = arith.constant 273 : index
    %8 = vector.load %arg7[%c0_10, %c273] : memref<16x290xf32, #tpu.memory_space<vmem>>, vector<16x17xf32>
    tpu.vector_store %arg7[%c0_10, %c273], %7 {strides = array<i32>} : memref<16x290xf32, #tpu.memory_space<vmem>>, vector<16x17xf32>,
    %c0_11 = arith.constant 0 : index
    %c17 = arith.constant 17 : index
    %9 = vector.load %arg7[%c0_11, %c17] : memref<16x290xf32, #tpu.memory_space<vmem>>, vector<16x256xf32>
    tpu.vector_store %arg7[%c0_11, %c17], %1 {strides = array<i32>} : memref<16x290xf32, #tpu.memory_space<vmem>>, vector<16x256xf32>,
    %10 = tpu.iota {dimensions = array<i32: 1>} : vector<1x256xi32>
    %c16_i32 = arith.constant 16 : i32
    %c0_i32 = arith.constant 0 : i32
    %11 = arith.cmpi eq, %c16_i32, %c0_i32 : i32
    %c1_i32 = arith.constant 1 : i32
    %12 = arith.select %11, %c1_i32, %c16_i32 : i32
    %13 = vector.broadcast %12 : i32 to vector<1x256xi32>
    %14 = arith.remsi %10, %13 : vector<1x256xi32>
    %c0_i32_12 = arith.constant 0 : i32
    %15 = vector.broadcast %c0_i32_12 : i32 to vector<1x256xi32>
    %16 = arith.cmpi ne, %14, %15 : vector<1x256xi32>
    %c0_i32_13 = arith.constant 0 : i32
    %17 = vector.broadcast %c0_i32_13 : i32 to vector<1x256xi32>
    %18 = arith.cmpi slt, %14, %17 : vector<1x256xi32>
    %c0_i32_14 = arith.constant 0 : i32
    %19 = arith.cmpi slt, %12, %c0_i32_14 : i32
    %20 = vector.broadcast %19 : i1 to vector<1x256xi1>
    %21 = vector.broadcast %20 : vector<1x256xi1> to vector<1x256xi1>
    %22 = arith.xori %18, %21 : vector<1x256xi1>
    %23 = arith.andi %22, %16 : vector<1x256xi1>
    %24 = vector.broadcast %12 : i32 to vector<1x256xi32>
    %25 = arith.addi %14, %24 : vector<1x256xi32>
    %26 = arith.select %23, %25, %14 : vector<1x256xi1>, vector<1x256xi32>
    %c1_i32_15 = arith.constant 1 : i32
    %27 = vector.broadcast %c1_i32_15 : i32 to vector<1x256xi32>
    %28 = arith.cmpi sge, %26, %27 : vector<1x256xi32>
    %c14_i32 = arith.constant 14 : i32
    %29 = vector.broadcast %c14_i32 : i32 to vector<1x256xi32>
    %30 = arith.cmpi sle, %26, %29 : vector<1x256xi32>
    %c0_16 = arith.constant 0 : index
    %c0_17 = arith.constant 0 : index
    %31 = vector.load %arg7[%c0_16, %c0_17] : memref<16x290xf32, #tpu.memory_space<vmem>>, vector<16x256xf32>
    %cst_18 = arith.constant 0.000000e+00 : f32
    %32 = vector.shape_cast %28 : vector<1x256xi1> to vector<1x256xi1>
    %33 = vector.broadcast %32 : vector<1x256xi1> to vector<16x256xi1>
    %34 = vector.broadcast %cst_18 : f32 to vector<16x256xf32>
    %35 = arith.select %33, %31, %34 : vector<16x256xi1>, vector<16x256xf32>
    %c0_19 = arith.constant 0 : index
    %c1 = arith.constant 1 : index
    %36 = vector.load %arg7[%c0_19, %c1] : memref<16x290xf32, #tpu.memory_space<vmem>>, vector<16x256xf32>
    %c0_20 = arith.constant 0 : index
    %c2 = arith.constant 2 : index
    %37 = vector.load %arg7[%c0_20, %c2] : memref<16x290xf32, #tpu.memory_space<vmem>>, vector<16x256xf32>
    %cst_21 = arith.constant 0.000000e+00 : f32
    %38 = vector.shape_cast %30 : vector<1x256xi1> to vector<1x256xi1>
    %39 = vector.broadcast %38 : vector<1x256xi1> to vector<16x256xi1>
    %40 = vector.broadcast %cst_21 : f32 to vector<16x256xf32>
    %41 = arith.select %39, %37, %40 : vector<16x256xi1>, vector<16x256xf32>
    %c0_22 = arith.constant 0 : index
    %c16 = arith.constant 16 : index
    %42 = vector.load %arg7[%c0_22, %c16] : memref<16x290xf32, #tpu.memory_space<vmem>>, vector<16x256xf32>
    %cst_23 = arith.constant 0.000000e+00 : f32
    %43 = vector.shape_cast %28 : vector<1x256xi1> to vector<1x256xi1>
    %44 = vector.broadcast %43 : vector<1x256xi1> to vector<16x256xi1>
    %45 = vector.broadcast %cst_23 : f32 to vector<16x256xf32>
    %46 = arith.select %44, %42, %45 : vector<16x256xi1>, vector<16x256xf32>
    %c0_24 = arith.constant 0 : index
    %c17_25 = arith.constant 17 : index
    %47 = vector.load %arg7[%c0_24, %c17_25] : memref<16x290xf32, #tpu.memory_space<vmem>>, vector<16x256xf32>
    %c0_26 = arith.constant 0 : index
    %c18 = arith.constant 18 : index
    %48 = vector.load %arg7[%c0_26, %c18] : memref<16x290xf32, #tpu.memory_space<vmem>>, vector<16x256xf32>
    %cst_27 = arith.constant 0.000000e+00 : f32
    %49 = vector.shape_cast %30 : vector<1x256xi1> to vector<1x256xi1>
    %50 = vector.broadcast %49 : vector<1x256xi1> to vector<16x256xi1>
    %51 = vector.broadcast %cst_27 : f32 to vector<16x256xf32>
    %52 = arith.select %50, %48, %51 : vector<16x256xi1>, vector<16x256xf32>
    %c0_28 = arith.constant 0 : index
    %c32 = arith.constant 32 : index
    %53 = vector.load %arg7[%c0_28, %c32] : memref<16x290xf32, #tpu.memory_space<vmem>>, vector<16x256xf32>
    %cst_29 = arith.constant 0.000000e+00 : f32
    %54 = vector.shape_cast %28 : vector<1x256xi1> to vector<1x256xi1>
    %55 = vector.broadcast %54 : vector<1x256xi1> to vector<16x256xi1>
    %56 = vector.broadcast %cst_29 : f32 to vector<16x256xf32>
    %57 = arith.select %55, %53, %56 : vector<16x256xi1>, vector<16x256xf32>
    %c0_30 = arith.constant 0 : index
    %c33 = arith.constant 33 : index
    %58 = vector.load %arg7[%c0_30, %c33] : memref<16x290xf32, #tpu.memory_space<vmem>>, vector<16x256xf32>
    %c0_31 = arith.constant 0 : index
    %c34 = arith.constant 34 : index
    %59 = vector.load %arg7[%c0_31, %c34] : memref<16x290xf32, #tpu.memory_space<vmem>>, vector<16x256xf32>
    %cst_32 = arith.constant 0.000000e+00 : f32
    %60 = vector.shape_cast %30 : vector<1x256xi1> to vector<1x256xi1>
    %61 = vector.broadcast %60 : vector<1x256xi1> to vector<16x256xi1>
    %62 = vector.broadcast %cst_32 : f32 to vector<16x256xf32>
    %63 = arith.select %61, %59, %62 : vector<16x256xi1>, vector<16x256xf32>
    %64 = tpu.concatenate %35, %36, %41, %46, %47, %52, %57, %58, %63 in 0 : vector<16x256xf32>, vector<16x256xf32>, vector<16x256xf32>, vector<16x256xf32>, vector<16x256xf32>, vector<16x256xf32>, vector<16x256xf32>, vector<16x256xf32>, vector<16x256xf32> -> vector<144x256xf32>
    %cst_33 = arith.constant dense<0.000000e+00> : vector<8x256xf32>
    %65 = tpu.matmul %4, %64, %cst_33 {dimension_numbers = #tpu.dot_dimension_numbers<[1], [0], [0], [1], [0, 0, 1, 1], [], []>} : vector<8x144xf32>, vector<144x256xf32>, vector<8x256xf32> -> vector<8x256xf32>
    %66 = vector.extract_strided_slice %3 {offsets = [0, 0], sizes = [8, 1], strides = [1, 1]} : vector<11x3xf32> to vector<8x1xf32>
    %67 = vector.extract_strided_slice %3 {offsets = [0, 1], sizes = [8, 1], strides = [1, 1]} : vector<11x3xf32> to vector<8x1xf32>
    %68 = vector.extract_strided_slice %3 {offsets = [0, 2], sizes = [8, 1], strides = [1, 1]} : vector<11x3xf32> to vector<8x1xf32>
    %69 = vector.broadcast %66 : vector<8x1xf32> to vector<8x256xf32>
    %70 = arith.addf %65, %69 : vector<8x256xf32>
    %cst_34 = arith.constant dense<0.000000e+00> : vector<8xf32>
    %71 = vector.multi_reduction <add>, %70, %cst_34 [1] : vector<8x256xf32> to vector<8xf32>
    %72 = vector.shape_cast %71 : vector<8xf32> to vector<8x1xf32>
    %cst_35 = arith.constant 2.560000e+02 : f32
    %73 = vector.broadcast %cst_35 : f32 to vector<8x1xf32>
    %74 = arith.divf %72, %73 : vector<8x1xf32>
    %75 = vector.broadcast %74 : vector<8x1xf32> to vector<8x256xf32>
    %76 = arith.subf %70, %75 : vector<8x256xf32>
    %77 = arith.mulf %76, %76 : vector<8x256xf32>
    %cst_36 = arith.constant dense<0.000000e+00> : vector<8xf32>
    %78 = vector.multi_reduction <add>, %77, %cst_36 [1] : vector<8x256xf32> to vector<8xf32>
    %79 = vector.shape_cast %78 : vector<8xf32> to vector<8x1xf32>
    %cst_37 = arith.constant 2.560000e+02 : f32
    %80 = vector.broadcast %cst_37 : f32 to vector<8x1xf32>
    %81 = arith.divf %79, %80 : vector<8x1xf32>
    %82 = vector.broadcast %74 : vector<8x1xf32> to vector<8x256xf32>
    %83 = arith.subf %70, %82 : vector<8x256xf32>
    %cst_38 = arith.constant 9.99999974E-6 : f32
    %84 = vector.broadcast %cst_38 : f32 to vector<8x1xf32>
    %85 = arith.addf %81, %84 : vector<8x1xf32>
    %86 = math.rsqrt %85 : vector<8x1xf32>
    %87 = vector.broadcast %86 : vector<8x1xf32> to vector<8x256xf32>
    %88 = arith.mulf %83, %87 : vector<8x256xf32>
    %89 = vector.broadcast %68 : vector<8x1xf32> to vector<8x256xf32>
    %90 = arith.mulf %88, %89 : vector<8x256xf32>
    %91 = vector.broadcast %67 : vector<8x1xf32> to vector<8x256xf32>
    %92 = arith.addf %90, %91 : vector<8x256xf32>
    %cst_39 = arith.constant 0.000000e+00 : f32
    %93 = vector.broadcast %cst_39 : f32 to vector<8x256xf32>
    %94 = arith.maximumf %92, %93 : vector<8x256xf32>
    %c0_40 = arith.constant 0 : index
    %c0_41 = arith.constant 0 : index
    %95 = vector.load %arg4[%c0_40, %c0_41] : memref<256x1024xf32, #tpu.memory_space<vmem>>, vector<256x1024xf32>
    %cst_42 = arith.constant dense<0.000000e+00> : vector<8x1024xf32>
    %96 = tpu.matmul %94, %95, %cst_42 {dimension_numbers = #tpu.dot_dimension_numbers<[1], [0], [0], [1], [0, 0, 1, 1], [], []>} : vector<8x256xf32>, vector<256x1024xf32>, vector<8x1024xf32> -> vector<8x1024xf32>
    %c0_43 = arith.constant 0 : index
    %c0_44 = arith.constant 0 : index
    %97 = vector.load %arg3[%c0_43, %c0_44] : memref<3x72xf32, #tpu.memory_space<vmem>>, vector<3x72xf32>
    %cst_45 = arith.constant 0.000000e+00 : f32
    %98 = vector.broadcast %cst_45 : f32 to vector<8x33xf32>
    %c0_46 = arith.constant 0 : index
    %c0_47 = arith.constant 0 : index
    %99 = vector.load %arg8[%c0_46, %c0_47] : memref<8x1090xf32, #tpu.memory_space<vmem>>, vector<8x33xf32>
    tpu.vector_store %arg8[%c0_46, %c0_47], %98 {strides = array<i32>} : memref<8x1090xf32, #tpu.memory_space<vmem>>, vector<8x33xf32>,
    %cst_48 = arith.constant 0.000000e+00 : f32
    %100 = vector.broadcast %cst_48 : f32 to vector<8x33xf32>
    %c0_49 = arith.constant 0 : index
    %c1057 = arith.constant 1057 : index
    %101 = vector.load %arg8[%c0_49, %c1057] : memref<8x1090xf32, #tpu.memory_space<vmem>>, vector<8x33xf32>
    tpu.vector_store %arg8[%c0_49, %c1057], %100 {strides = array<i32>} : memref<8x1090xf32, #tpu.memory_space<vmem>>, vector<8x33xf32>,
    %c0_50 = arith.constant 0 : index
    %c33_51 = arith.constant 33 : index
    %102 = vector.load %arg8[%c0_50, %c33_51] : memref<8x1090xf32, #tpu.memory_space<vmem>>, vector<8x1024xf32>
    tpu.vector_store %arg8[%c0_50, %c33_51], %96 {strides = array<i32>} : memref<8x1090xf32, #tpu.memory_space<vmem>>, vector<8x1024xf32>,
    %103 = tpu.iota {dimensions = array<i32: 1>} : vector<1x1024xi32>
    %c32_i32 = arith.constant 32 : i32
    %c0_i32_52 = arith.constant 0 : i32
    %104 = arith.cmpi eq, %c32_i32, %c0_i32_52 : i32
    %c1_i32_53 = arith.constant 1 : i32
    %105 = arith.select %104, %c1_i32_53, %c32_i32 : i32
    %106 = vector.broadcast %105 : i32 to vector<1x1024xi32>
    %107 = arith.remsi %103, %106 : vector<1x1024xi32>
    %c0_i32_54 = arith.constant 0 : i32
    %108 = vector.broadcast %c0_i32_54 : i32 to vector<1x1024xi32>
    %109 = arith.cmpi ne, %107, %108 : vector<1x1024xi32>
    %c0_i32_55 = arith.constant 0 : i32
    %110 = vector.broadcast %c0_i32_55 : i32 to vector<1x1024xi32>
    %111 = arith.cmpi slt, %107, %110 : vector<1x1024xi32>
    %c0_i32_56 = arith.constant 0 : i32
    %112 = arith.cmpi slt, %105, %c0_i32_56 : i32
    %113 = vector.broadcast %112 : i1 to vector<1x1024xi1>
    %114 = vector.broadcast %113 : vector<1x1024xi1> to vector<1x1024xi1>
    %115 = arith.xori %111, %114 : vector<1x1024xi1>
    %116 = arith.andi %115, %109 : vector<1x1024xi1>
    %117 = vector.broadcast %105 : i32 to vector<1x1024xi32>
    %118 = arith.addi %107, %117 : vector<1x1024xi32>
    %119 = arith.select %116, %118, %107 : vector<1x1024xi1>, vector<1x1024xi32>
    %c1_i32_57 = arith.constant 1 : i32
    %120 = vector.broadcast %c1_i32_57 : i32 to vector<1x1024xi32>
    %121 = arith.cmpi sge, %119, %120 : vector<1x1024xi32>
    %c30_i32 = arith.constant 30 : i32
    %122 = vector.broadcast %c30_i32 : i32 to vector<1x1024xi32>
    %123 = arith.cmpi sle, %119, %122 : vector<1x1024xi32>
    %c0_58 = arith.constant 0 : index
    %c0_59 = arith.constant 0 : index
    %124 = vector.load %arg8[%c0_58, %c0_59] : memref<8x1090xf32, #tpu.memory_space<vmem>>, vector<8x1024xf32>
    %cst_60 = arith.constant 0.000000e+00 : f32
    %125 = vector.shape_cast %121 : vector<1x1024xi1> to vector<1x1024xi1>
    %126 = vector.broadcast %125 : vector<1x1024xi1> to vector<8x1024xi1>
    %127 = vector.broadcast %cst_60 : f32 to vector<8x1024xf32>
    %128 = arith.select %126, %124, %127 : vector<8x1024xi1>, vector<8x1024xf32>
    %c0_61 = arith.constant 0 : index
    %c1_62 = arith.constant 1 : index
    %129 = vector.load %arg8[%c0_61, %c1_62] : memref<8x1090xf32, #tpu.memory_space<vmem>>, vector<8x1024xf32>
    %c0_63 = arith.constant 0 : index
    %c2_64 = arith.constant 2 : index
    %130 = vector.load %arg8[%c0_63, %c2_64] : memref<8x1090xf32, #tpu.memory_space<vmem>>, vector<8x1024xf32>
    %cst_65 = arith.constant 0.000000e+00 : f32
    %131 = vector.shape_cast %123 : vector<1x1024xi1> to vector<1x1024xi1>
    %132 = vector.broadcast %131 : vector<1x1024xi1> to vector<8x1024xi1>
    %133 = vector.broadcast %cst_65 : f32 to vector<8x1024xf32>
    %134 = arith.select %132, %130, %133 : vector<8x1024xi1>, vector<8x1024xf32>
    %c0_66 = arith.constant 0 : index
    %c32_67 = arith.constant 32 : index
    %135 = vector.load %arg8[%c0_66, %c32_67] : memref<8x1090xf32, #tpu.memory_space<vmem>>, vector<8x1024xf32>
    %cst_68 = arith.constant 0.000000e+00 : f32
    %136 = vector.shape_cast %121 : vector<1x1024xi1> to vector<1x1024xi1>
    %137 = vector.broadcast %136 : vector<1x1024xi1> to vector<8x1024xi1>
    %138 = vector.broadcast %cst_68 : f32 to vector<8x1024xf32>
    %139 = arith.select %137, %135, %138 : vector<8x1024xi1>, vector<8x1024xf32>
    %c0_69 = arith.constant 0 : index
    %c33_70 = arith.constant 33 : index
    %140 = vector.load %arg8[%c0_69, %c33_70] : memref<8x1090xf32, #tpu.memory_space<vmem>>, vector<8x1024xf32>
    %c0_71 = arith.constant 0 : index
    %c34_72 = arith.constant 34 : index
    %141 = vector.load %arg8[%c0_71, %c34_72] : memref<8x1090xf32, #tpu.memory_space<vmem>>, vector<8x1024xf32>
    %cst_73 = arith.constant 0.000000e+00 : f32
    %142 = vector.shape_cast %123 : vector<1x1024xi1> to vector<1x1024xi1>
    %143 = vector.broadcast %142 : vector<1x1024xi1> to vector<8x1024xi1>
    %144 = vector.broadcast %cst_73 : f32 to vector<8x1024xf32>
    %145 = arith.select %143, %141, %144 : vector<8x1024xi1>, vector<8x1024xf32>
    %c0_74 = arith.constant 0 : index
    %c64 = arith.constant 64 : index
    %146 = vector.load %arg8[%c0_74, %c64] : memref<8x1090xf32, #tpu.memory_space<vmem>>, vector<8x1024xf32>
    %cst_75 = arith.constant 0.000000e+00 : f32
    %147 = vector.shape_cast %121 : vector<1x1024xi1> to vector<1x1024xi1>
    %148 = vector.broadcast %147 : vector<1x1024xi1> to vector<8x1024xi1>
    %149 = vector.broadcast %cst_75 : f32 to vector<8x1024xf32>
    %150 = arith.select %148, %146, %149 : vector<8x1024xi1>, vector<8x1024xf32>
    %c0_76 = arith.constant 0 : index
    %c65 = arith.constant 65 : index
    %151 = vector.load %arg8[%c0_76, %c65] : memref<8x1090xf32, #tpu.memory_space<vmem>>, vector<8x1024xf32>
    %c0_77 = arith.constant 0 : index
    %c66 = arith.constant 66 : index
    %152 = vector.load %arg8[%c0_77, %c66] : memref<8x1090xf32, #tpu.memory_space<vmem>>, vector<8x1024xf32>
    %cst_78 = arith.constant 0.000000e+00 : f32
    %153 = vector.shape_cast %123 : vector<1x1024xi1> to vector<1x1024xi1>
    %154 = vector.broadcast %153 : vector<1x1024xi1> to vector<8x1024xi1>
    %155 = vector.broadcast %cst_78 : f32 to vector<8x1024xf32>
    %156 = arith.select %154, %152, %155 : vector<8x1024xi1>, vector<8x1024xf32>
    %157 = tpu.concatenate %128, %129, %134, %139, %140, %145, %150, %151, %156 in 0 : vector<8x1024xf32>, vector<8x1024xf32>, vector<8x1024xf32>, vector<8x1024xf32>, vector<8x1024xf32>, vector<8x1024xf32>, vector<8x1024xf32>, vector<8x1024xf32>, vector<8x1024xf32> -> vector<72x1024xf32>
    %cst_79 = arith.constant dense<0.000000e+00> : vector<3x1024xf32>
    %158 = tpu.matmul %97, %157, %cst_79 {dimension_numbers = #tpu.dot_dimension_numbers<[1], [0], [0], [1], [0, 0, 1, 1], [], []>} : vector<3x72xf32>, vector<72x1024xf32>, vector<3x1024xf32> -> vector<3x1024xf32>
    %159 = vector.extract_strided_slice %3 {offsets = [8, 0], sizes = [3, 1], strides = [1, 1]} : vector<11x3xf32> to vector<3x1xf32>
    %160 = vector.extract_strided_slice %3 {offsets = [8, 1], sizes = [3, 1], strides = [1, 1]} : vector<11x3xf32> to vector<3x1xf32>
    %161 = vector.extract_strided_slice %3 {offsets = [8, 2], sizes = [3, 1], strides = [1, 1]} : vector<11x3xf32> to vector<3x1xf32>
    %162 = vector.broadcast %159 : vector<3x1xf32> to vector<3x1024xf32>
    %163 = arith.addf %158, %162 : vector<3x1024xf32>
    %cst_80 = arith.constant dense<0.000000e+00> : vector<3xf32>
    %164 = vector.multi_reduction <add>, %163, %cst_80 [1] : vector<3x1024xf32> to vector<3xf32>
    %165 = vector.shape_cast %164 : vector<3xf32> to vector<3x1xf32>
    %cst_81 = arith.constant 1.024000e+03 : f32
    %166 = vector.broadcast %cst_81 : f32 to vector<3x1xf32>
    %167 = arith.divf %165, %166 : vector<3x1xf32>
    %168 = vector.broadcast %167 : vector<3x1xf32> to vector<3x1024xf32>
    %169 = arith.subf %163, %168 : vector<3x1024xf32>
    %170 = arith.mulf %169, %169 : vector<3x1024xf32>
    %cst_82 = arith.constant dense<0.000000e+00> : vector<3xf32>
    %171 = vector.multi_reduction <add>, %170, %cst_82 [1] : vector<3x1024xf32> to vector<3xf32>
    %172 = vector.shape_cast %171 : vector<3xf32> to vector<3x1xf32>
    %cst_83 = arith.constant 1.024000e+03 : f32
    %173 = vector.broadcast %cst_83 : f32 to vector<3x1xf32>
    %174 = arith.divf %172, %173 : vector<3x1xf32>
    %175 = vector.broadcast %167 : vector<3x1xf32> to vector<3x1024xf32>
    %176 = arith.subf %163, %175 : vector<3x1024xf32>
    %cst_84 = arith.constant 9.99999974E-6 : f32
    %177 = vector.broadcast %cst_84 : f32 to vector<3x1xf32>
    %178 = arith.addf %174, %177 : vector<3x1xf32>
    %179 = math.rsqrt %178 : vector<3x1xf32>
    %180 = vector.broadcast %179 : vector<3x1xf32> to vector<3x1024xf32>
    %181 = arith.mulf %176, %180 : vector<3x1024xf32>
    %182 = vector.broadcast %161 : vector<3x1xf32> to vector<3x1024xf32>
    %183 = arith.mulf %181, %182 : vector<3x1024xf32>
    %184 = vector.broadcast %160 : vector<3x1xf32> to vector<3x1024xf32>
    %185 = arith.addf %183, %184 : vector<3x1024xf32>
    %cst_85 = arith.constant 0.000000e+00 : f32
    %186 = vector.broadcast %cst_85 : f32 to vector<3x1024xf32>
    %187 = arith.maximumf %185, %186 : vector<3x1024xf32>
    %c0_86 = arith.constant 0 : index
    %c0_87 = arith.constant 0 : index
    %c0_88 = arith.constant 0 : index
    %188 = vector.load %arg6[%c0_86, %c0_87, %c0_88] : memref<1x3x1024xf32, #tpu.memory_space<vmem>>, vector<1x3x1024xf32>
    %189 = vector.shape_cast %188 : vector<1x3x1024xf32> to vector<3x1024xf32>
    %190 = vector.shape_cast %187 : vector<3x1024xf32> to vector<1x3x1024xf32>
    tpu.vector_store %arg6[%c0_86, %c0_87, %c0_88], %190 {strides = array<i32>} : memref<1x3x1024xf32, #tpu.memory_space<vmem>>, vector<1x3x1024xf32>,
    return
  }
  func.func @transform_0(%arg0: i32) -> (i32, i32, i32) {
    %c0_i32 = arith.constant 0 : i32
    %c0_i32_0 = arith.constant 0 : i32
    %c0_i32_1 = arith.constant 0 : i32
    return %arg0, %c0_i32, %c0_i32_0 : i32, i32, i32
  }
  func.func @transform_1(%arg0: i32) -> (i32, i32) {
    %c0_i32 = arith.constant 0 : i32
    %c0_i32_0 = arith.constant 0 : i32
    %c0_i32_1 = arith.constant 0 : i32
    return %c0_i32, %c0_i32_0 : i32, i32
  }
  func.func @transform_2(%arg0: i32) -> (i32, i32) {
    %c0_i32 = arith.constant 0 : i32
    %c0_i32_0 = arith.constant 0 : i32
    %c0_i32_1 = arith.constant 0 : i32
    return %c0_i32, %c0_i32_0 : i32, i32
  }
  func.func @transform_3(%arg0: i32) -> (i32, i32) {
    %c0_i32 = arith.constant 0 : i32
    %c0_i32_0 = arith.constant 0 : i32
    %c0_i32_1 = arith.constant 0 : i32
    return %c0_i32, %c0_i32_0 : i32, i32
  }
  func.func @transform_4(%arg0: i32) -> (i32, i32, i32) {
    %c0_i32 = arith.constant 0 : i32
    %c0_i32_0 = arith.constant 0 : i32
    %c0_i32_1 = arith.constant 0 : i32
    return %arg0, %c0_i32, %c0_i32_0 : i32, i32, i32
  }
  func.func @transform_5(%arg0: i32) -> (i32, i32, i32) {
    %c0_i32 = arith.constant 0 : i32
    %c0_i32_0 = arith.constant 0 : i32
    %c0_i32_1 = arith.constant 0 : i32
    return %arg0, %c0_i32, %c0_i32_0 : i32, i32, i32
  }
}

</mosaic_0001>

<bundles_post_ra>
// kernel: vgg_dec_forward.1
= control target key start
LH: loop header
LB: loop body
LE: loop exit
PB: predicated region body
PF: predicated region fallthrough
CT: control target
= control target key end

     0   :  { %10 = vsyncpa [#allocation5], 0  ;;  %s3123_s18 = smov 0   ;;  %s4009_s0 = inlined_call_operand.vmem [shape: f32[2,16,256], index: 0, kind: input, shape index: {}]   ;;  %s4010_s1 = inlined_call_operand.vmem [shape: f32[8,144], index: 1, kind: input, shape index: {}]   ;;  %s4011_s2 = inlined_call_operand.vmem [shape: f32[3,72], index: 2, kind: input, shape index: {}]   ;;  %s4012_s3 = inlined_call_operand.hbm [shape: f32[256,1024], index: 3, kind: input, shape index: {}]   ;;  %s4013_s4 = inlined_call_operand.vmem [shape: f32[2,11,3], index: 4, kind: input, shape index: {}]   ;;  %s4014_s5 = inlined_call_operand.vmem [shape: f32[2,3,1024], index: 5, kind: output, shape index: {}]  }
   0x1 LB: > { %s3129_s19 = sadd.s32 4294967295, %s3070_s18   ;;  %p2231_p0 = scmp.ge.s32.totalorder %s3070_s18, 1  ;;  %s3070_s18 = sphi %s3123_s18, %s16_s18  }
   0x2   : > { %p162_p1 = scmp.lt.s32.totalorder %s3070_s18, 3  ;;  %s3072_s20 = smov [#allocation4]  }
   0x3   : > { %s180_s21 = sshll.u32 %s3072_s20, 4  ;;  %p4015_p3 = scmp.eq.s32.totalorder %s3129_s19, 0  ;;  %s181_s21 = int_to_ptr.vmem [resolvable:$true] %s180_s21 }
   0x4   : > { %p3133_p2 = pnand %p2231_p0, %p162_p1  ;;  %s3032_s26 = scalar_lea.hbm %s4012_s3, 32768 }
   0x5   : > { %p3033_p6 = scmp.ne.s32.totalorder %s4012_s3, %s3032_s26  ;;  %p3039_p10 = scmp.lt.u32.totalorder %s3032_s26, %s4012_s3 }
   0x6   : > { %s4030_s22 = scalar_select %p3133_p2, 1, 0 }
   0x7   : > { %p2728_p4 = pneg %p3133_p2 }
   0x9   : > { %p3142_p5 = pnand %p4015_p3, %p2728_p4 }
   0xb   : > { %p3034_p7 = pneg %p3142_p5 }
   0xd   : > { %p3035_p8 = pnand %p3034_p7, %p3033_p6 }
   0xf   : > { %p3036_p9 = pneg %p3035_p8 }
  0x11   : > { %p3041_p11 = pnand %p3039_p10, %p3036_p9 }
  0x13   : > { %3044 = shalt.err (!%p3041_p11)
}
  0x14   : > { %s3045_s6 = scalar_lea.vmem %s181_s21, 32768  ;;  %p3053_p1 = scmp.lt.s32.totalorder %s181_s21, %s181_s21 }
  0x15   : > { %p3046_p12 = scmp.ne.s32.totalorder %s181_s21, %s3045_s6  ;;  %p3054_p4 = scmp.lt.s32.totalorder %s3045_s6, %s3045_s6 }
  0x17   : > { %p3048_p13 = pnand %p3046_p12, %p3034_p7  ;;  %p3055_p3 = por %p3054_p4, %p3053_p1 }
  0x19   : > { %p3049_p0 = pneg %p3048_p13 }
  0x1b   : > { %p3056_p2 = pnand %p3055_p3, %p3049_p0 }
  0x1d   : > { %3059 = shalt.err (!%p3056_p2)
}
  0x1e   : > { %s3073_s7 = smov 1024   ;;  %s3074_s8 = smov 64  }
  0x1f   : > { %2731 = dma.hbm_to_vmem [thread:$0]  (!%p3142_p5), %s4012_s3, 32768, %s181_s21, [#allocation5], %s3073_s7, %s3073_s7, %s3074_s8  }
  0x20   : > { %p4032_p6 = scmp.ne.s32.totalorder %s4030_s22, 0 }
  0x21   : > { %p4033_p8 = scmp.eq.s32.totalorder (!%p4032_p6), %s3129_s19, 0 }
  0x22   : > { %212 = sbr.rel (%p4032_p6) target bundleno = 2008 (0x7d8), region = 40 }
  0x29   : > { %3065 = dma.done.wait (%p4033_p8), [#allocation5], 32768   ;;  %p4034_p7 = pmov %p4033_p8 }
  0x2a   : > { %p245_p2 = scmp.lt.s32.totalorder %s3129_s19, 1  ;;  %vm268_vm0 = vcmask 138240   ;;  %v3075_v0 = vmov 0.0   ;;  %vm271_vm1 = vcmask 277640   ;;  %s3076_s15 = smov 17   ;;  %v301_v5 = vlaneseq  ;;  %v267_v27 = vld [vmem:[%s4010_s1 + $0x8] sm:$0xff] }
  0x2b   : > { %3067 = vsyncadd (%p4034_p7), [#allocation5], 4294934528  ;;  %270 = vst.msk [vmem:[#allocation2 + $0x18] sm:$0xff] %vm268_vm0, %v3075_v0  ;;  %vm294_vm2 = vcmask 1047688   ;;  %s3077_s16 = smov 126   ;;  %s3078_s17 = smov 127  }
  0x2c   : > { %269 = vst.msk [vmem:[#allocation2] sm:$0xff] %vm268_vm0, %v3075_v0  ;;  %s4134_s19 = smov (!%p245_p2, %s3129_s19), 1  ;;  %v3184_v6 = vand.u32 127, %v301_v5  ;;  %s3079_s20 = smov 111   ;;  %vm549_vm7 = vcmask 130048   ;;  %v3085_v28 = vmov 0  }
  0x2d   : > { %273 = vst.msk [vmem:[#allocation2 + $0x28] sm:$0xff] %vm271_vm1, %v3075_v0  ;;  %272 = vst.msk [vmem:[#allocation2 + $0x10] sm:$0xff] %vm271_vm1, %v3075_v0  ;;  %s2321_s11 = sshll.u32 %s4134_s19, 5  ;;  %s3080_s21 = smov 112   ;;  %2266 = vmatprep.mubr.msk.f32.mxu0 %vm549_vm7, %v267_v27  ;;  %2883 = vset.pattern.permute.xlu0 %v3085_v28  ;;  %vm493_vm8 = vcmask 1039360   ;;  %vm4018_vm9 = vcmask 1031168  }
  0x2e   : > { %s249_s14 = scalar_lea.vmem %s4009_s0, %s2321_s11  ;;  %v3187_v7 = vadd.s32 128, %v3184_v6  ;;  %v308_v11 = vand.u32 15, %v3184_v6  ;;  %s3081_s22 = smov 96   ;;  %vm393_vm12 = vcmask 916480   ;;  %vm514_vm15 = vcmask 908288  }
  0x2f   : > { %v262_v1 = vld [vmem:[%s249_s14 + $0x10] sm:$0xff]  ;;  %v260_v2 = vld [vmem:[%s249_s14] sm:$0xff]  ;;  %v263_v3 = vld [vmem:[%s249_s14 + $0x18] sm:$0xff]  ;;  %s3082_s23 = smov 110   ;;  %s3083_s24 = smov 95   ;;  %vm4024_vm1 = vcmask 785408  }
  0x30   : > { %282 = vrot.lane.b32.xlu1 %v262_v1, %s3076_s15  ;;  %278 = vrot.lane.b32.xlu0 %v260_v2, %s3076_s15  ;;  %v261_v4 = vld [vmem:[%s249_s14 + $0x8] sm:$0xff]  ;;  %v315_v8 = vand.u32 15, %v3187_v7  ;;  %vm328_vm5 = vcmp.ge.s32.totalorder %v308_v11, 1  ;;  %s3084_s27 = smov 94   ;;  %s2322_s28 = sshll.u32 %s4134_s19, 4  ;;  %vm3256_vm11 = vcmp.le.s32.totalorder %v308_v11, 14 }
  0x31   : > { %vm3205_vm6 = vmpackc.low %vm328_vm5, %vm328_vm5  ;;  %s3232_s6 = scalar_lea.vmem %s4013_s4, %s2322_s28  ;;  %s3088_s9 = smov 33   ;;  %vm1198_vm5 = vcmask 539912  }
  0x32   : > { %vm329_vm3 = vcmp.ge.s32.totalorder %v315_v8, 1  ;;  %v3237_v29 = vld [vmem:[%s3232_s6] sm:$0xff]  ;;  %vm331_vm10 = vcmp.le.s32.totalorder %v315_v8, 14  ;;  %vm3271_vm14 = vmpackc.low %vm3256_vm11, %vm3256_vm11  ;;  %1199 = vst.msk [vmem:[#allocation3 + $0x40] sm:$0xff] %vm1198_vm5, %v3075_v0  ;;  %s3089_s10 = smov 62   ;;  %s3090_s12 = smov 64  }
  0x33   : > { %vm3197_vm4 = vmpackc.low %vm329_vm3, %vm329_vm3  ;;  %vm4020_vm3 = vcmask 769024   ;;  %s3091_s13 = smov 63  }
  0x34   : > { %284 = vrot.lane.b32.xlu1 %v263_v3, %s3076_s15  ;;  %280 = vrot.lane.b32.xlu0 %v261_v4, %s3076_s15  ;;  %vm3264_vm13 = vmpackc.low %vm331_vm10, %vm331_vm10  ;;  %v3086_v4 = vmov 2   ;;  %vm4026_vm10 = vmmov 1  }
  0x35   : > { %2884 = vset.pattern.permute.xlu1 %v3086_v4  ;;  %v721_v4 = vld [vmem:[#allocation4 + $0x210] sm:$0xff] }
  0xa2   : > { %v283_v9 = vpop.permute.xlu1 %282  ;;  %v279_v10 = vpop.permute.xlu0 %278 }
  0xa3   : > { %298 = vst.msk [vmem:[#allocation2 + $0x18] sm:$0xff] %vm294_vm2, %v283_v9  ;;  %295 = vst.msk [vmem:[#allocation2] sm:$0xff] %vm294_vm2, %v279_v10  ;;  %vm4022_vm2 = vcmask 777216  }
  0xa6   : > { %v285_v12 = vpop.permute.xlu1 %284  ;;  %v281_v13 = vpop.permute.xlu0 %280 }
  0xa7   : > { %v287_v14 = vsel %vm268_vm0, %v283_v9, %v285_v12  ;;  %300 = vst.msk [vmem:[#allocation2 + $0x28] sm:$0xff] %vm268_vm0, %v285_v12  ;;  %v286_v15 = vsel %vm268_vm0, %v279_v10, %v281_v13  ;;  %297 = vst.msk [vmem:[#allocation2 + $0x10] sm:$0xff] %vm268_vm0, %v281_v13  ;;  %vm418_vm0 = vcmask 900096   ;;  %v3087_v12 = vmov 1  }
  0xa8   : > { %v2324_v17 = vpack.c.bf16 %v287_v14, %v286_v15 }
  0xaa   : > { %v332_v18 = vld [vmem:[#allocation2] sm:$0xff]  ;;  %v334_v19 = vld [vmem:[#allocation2 + $0x18] sm:$0xff]  ;;  %2326 = vmatprep.subr.msk.bf16.mxu0 %vm3197_vm4, %v2324_v17 }
  0xab   : > { %v2768_v20 = vpack.i.bf16 %v334_v19, %v332_v18  ;;  %v2327_v22 = vpack.c.bf16 %v334_v19, %v332_v18 }
  0xad   : > { %2769 = vrot.lane.b32.xlu1 %v2768_v20, %s3077_s16  ;;  %2764 = vrot.lane.b32.xlu0 %v2768_v20, %s3078_s17 }
  0xae   : > { %2329 = vmatpush1.bf16.msk.msra.mxu0 %vm3205_vm6, %v2327_v22  ;;  %v345_v23 = vld [vmem:[#allocation2 + $0x28] sm:$0xff]  ;;  %v344_v25 = vld [vmem:[#allocation2 + $0x10] sm:$0xff] }
  0xaf   : > { %v2803_v24 = vpack.i.bf16 %v345_v23, %v287_v14  ;;  %v2808_v26 = vpack.i.bf16 %v344_v25, %v286_v15 }
  0xb1   : > { %2779 = vrot.lane.b32.xlu1 %v2768_v20, %s3079_s20  ;;  %2774 = vrot.lane.b32.xlu0 %v2768_v20, %s3080_s21 }
  0xb5   : > { %2789 = vrot.lane.b32.xlu1 %v2768_v20, %s3081_s22  ;;  %2784 = vrot.lane.b32.xlu0 %v2768_v20, %s3082_s23 }
  0xb9   : > { %2804 = vrot.lane.b32.xlu1 %v2803_v24, %s3078_s17  ;;  %2794 = vrot.lane.b32.xlu0 %v2768_v20, %s3083_s24 }
  0xbd   : > { %2809 = vrot.lane.b32.xlu1 %v2808_v26, %s3077_s16  ;;  %2799 = vrot.lane.b32.xlu0 %v2808_v26, %s3078_s17 }
  0xc1   : > { %2824 = vrot.lane.b32.xlu1 %v2803_v24, %s3080_s21  ;;  %2814 = vrot.lane.b32.xlu0 %v2803_v24, %s3077_s16 }
  0xc5   : > { %2829 = vrot.lane.b32.xlu1 %v2808_v26, %s3079_s20  ;;  %2819 = vrot.lane.b32.xlu0 %v2808_v26, %s3080_s21 }
  0xc9   : > { %2844 = vrot.lane.b32.xlu1 %v2803_v24, %s3082_s23  ;;  %2834 = vrot.lane.b32.xlu0 %v2803_v24, %s3079_s20  ;;  %s259_s20 = scalar_lea.vmem %s4014_s5, %s2321_s11 }
  0xcd   : > { %2849 = vrot.lane.b32.xlu1 %v2808_v26, %s3081_s22  ;;  %2839 = vrot.lane.b32.xlu0 %v2808_v26, %s3082_s23 }
  0xd1   : > { %2864 = vrot.lane.b32.xlu1 %v2803_v24, %s3083_s24  ;;  %2854 = vrot.lane.b32.xlu0 %v2803_v24, %s3081_s22 }
  0xd5   : > { %2869 = vrot.lane.b32.xlu1 %v2808_v26, %s3084_s27  ;;  %2859 = vrot.lane.b32.xlu0 %v2808_v26, %s3083_s24 }
  0xd9   : > { %2879 = vrot.lane.b32.xlu1 %v2768_v20, %s3084_s27  ;;  %2874 = vrot.lane.b32.xlu0 %v2803_v24, %s3084_s27 }
  0xdd   : > { %546 = vperm.xlu0 %2883, %v3237_v29  }
  0xe1   : > { %2885 = vset.pattern.permute.xlu0 %v3087_v12 }
 0x11f   : > { %v2770_v30 = vpop.permute.xlu1 %2769  ;;  %v2765_v31 = vpop.permute.xlu0 %2764 }
 0x120   : > { %v2767_v40 = vunpack.i.h.bf16 %v2765_v31  ;;  %v2766_v43 = vunpack.i.l.bf16 %v2765_v31  ;;  %v2772_v57 = vunpack.i.h.bf16 %v2770_v30  ;;  %v2771_v58 = vunpack.i.l.bf16 %v2770_v30 }
 0x123   : > { %v3240_v32 = vpop.permute.xlu1 %2779  ;;  %v2775_v33 = vpop.permute.xlu0 %2774 }
 0x124   : > { %v2777_v5 = vunpack.i.h.bf16 %v2775_v33  ;;  %v2776_v13 = vunpack.i.l.bf16 %v2775_v33  ;;  %v2782_v30 = vunpack.i.h.bf16 %v3240_v32  ;;  %v2781_v31 = vunpack.i.l.bf16 %v3240_v32 }
 0x127   : > { %v3242_v34 = vpop.permute.xlu1 %2789  ;;  %v3244_v35 = vpop.permute.xlu0 %2784 }
 0x12b   : > { %v2805_v36 = vpop.permute.xlu1 %2804  ;;  %v3246_v37 = vpop.permute.xlu0 %2794 }
 0x12c   : > { %v2807_v38 = vunpack.i.h.bf16 %v2805_v36  ;;  %v2806_v39 = vunpack.i.l.bf16 %v2805_v36 }
 0x12e   : > { %v497_v46 = vsel %vm493_vm8, %v2806_v39, %v2807_v38  ;;  %v496_v47 = vsel %vm493_vm8, %v2767_v40, %v2806_v39 }
 0x12f   : > { %v2810_v41 = vpop.permute.xlu1 %2809  ;;  %v2800_v42 = vpop.permute.xlu0 %2799 }
 0x130   : > { %v2802_v44 = vunpack.i.h.bf16 %v2800_v42  ;;  %v2801_v45 = vunpack.i.l.bf16 %v2800_v42  ;;  %v2812_v48 = vunpack.i.h.bf16 %v2810_v41  ;;  %v2811_v49 = vunpack.i.l.bf16 %v2810_v41 }
 0x132   : > { %v495_v50 = vsel %vm493_vm8, %v2801_v45, %v2802_v44  ;;  %v494_v51 = vsel %vm493_vm8, %v2766_v43, %v2801_v45  ;;  %v369_v63 = vsel %vm4018_vm9, %v2771_v58, %v2811_v49  ;;  %v370_v1 = vsel %vm4018_vm9, %v2811_v49, %v2812_v48 }
 0x133   : > { %v2825_v52 = vpop.permute.xlu1 %2824  ;;  %v2815_v53 = vpop.permute.xlu0 %2814  ;;  %v2330_v54 = vpack.c.bf16 %v497_v46, %v495_v50  ;;  %v2332_v55 = vpack.c.bf16 %v496_v47, %v494_v51  ;;  %v2787_v44 = vunpack.i.h.bf16 %v3244_v35  ;;  %v2786_v48 = vunpack.i.l.bf16 %v3244_v35 }
 0x134   : > { %v2817_v59 = vunpack.i.h.bf16 %v2815_v53  ;;  %v2816_v60 = vunpack.i.l.bf16 %v2815_v53  ;;  %v2827_v61 = vunpack.i.h.bf16 %v2825_v52  ;;  %v2826_v62 = vunpack.i.l.bf16 %v2825_v52 }
 0x135   : > { %2331 = vmatprep.subr.bf16.mxu0 %v2330_v54  ;;  %v2792_v35 = vunpack.i.h.bf16 %v3242_v34 }
 0x136   : > { %v371_v2 = vsel %vm4018_vm9, %v2772_v57, %v2816_v60  ;;  %v372_v3 = vsel %vm4018_vm9, %v2816_v60, %v2817_v59  ;;  %2333 = vmatpush1.bf16.msra.mxu0 %v2332_v55  ;;  %v396_v17 = vsel %vm393_vm12, %v2777_v5, %v2826_v62  ;;  %v397_v18 = vsel %vm393_vm12, %v2826_v62, %v2827_v61 }
 0x137   : > { %v2334_v8 = vpack.c.bf16 %v372_v3, %v370_v1  ;;  %v2337_v9 = vpack.c.bf16 %v371_v2, %v369_v63  ;;  %v2830_v10 = vpop.permute.xlu1 %2829  ;;  %v2820_v11 = vpop.permute.xlu0 %2819  ;;  %v2791_v61 = vunpack.i.l.bf16 %v3242_v34  ;;  %v2797_v34 = vunpack.i.h.bf16 %v3246_v37 }
 0x138   : > { %v2822_v14 = vunpack.i.h.bf16 %v2820_v11  ;;  %v2821_v15 = vunpack.i.l.bf16 %v2820_v11  ;;  %v2832_v19 = vunpack.i.h.bf16 %v2830_v10  ;;  %v2831_v20 = vunpack.i.l.bf16 %v2830_v10 }
 0x139   : > { %2336 = vmatprep.subr.msk.bf16.mxu0 %vm3264_vm13, %v2334_v8 }
 0x13a   : > { %v394_v22 = vsel %vm393_vm12, %v2776_v13, %v2821_v15  ;;  %v395_v23 = vsel %vm393_vm12, %v2821_v15, %v2822_v14  ;;  %2339 = vmatpush1.bf16.msk.msra.mxu0 %vm3271_vm14, %v2337_v9  ;;  %v516_v40 = vsel %vm514_vm15, %v2831_v20, %v2832_v19  ;;  %v515_v42 = vsel %vm514_vm15, %v2781_v31, %v2831_v20 }
 0x13b   : > { %v2340_v24 = vpack.c.bf16 %v397_v18, %v395_v23  ;;  %v2343_v25 = vpack.c.bf16 %v396_v17, %v394_v22  ;;  %v2845_v26 = vpop.permute.xlu1 %2844  ;;  %v2835_v27 = vpop.permute.xlu0 %2834  ;;  %v2796_v15 = vunpack.i.l.bf16 %v3246_v37 }
 0x13c   : > { %v2837_v33 = vunpack.i.h.bf16 %v2835_v27  ;;  %v2836_v36 = vunpack.i.l.bf16 %v2835_v27  ;;  %v2847_v38 = vunpack.i.h.bf16 %v2845_v26  ;;  %v2846_v39 = vunpack.i.l.bf16 %v2845_v26 }
 0x13d   : > { %2342 = vmatprep.subr.msk.bf16.mxu0 %vm3197_vm4, %v2340_v24 }
 0x13e   : > { %2345 = vmatpush1.bf16.msk.msra.mxu0 %vm3205_vm6, %v2343_v25  ;;  %v518_v41 = vsel %vm514_vm15, %v2836_v36, %v2837_v33  ;;  %v517_v43 = vsel %vm514_vm15, %v2782_v30, %v2836_v36  ;;  %v421_v51 = vsel %vm418_vm0, %v2787_v44, %v2846_v39  ;;  %v422_v52 = vsel %vm418_vm0, %v2846_v39, %v2847_v38 }
 0x13f   : > { %v2850_v45 = vpop.permute.xlu1 %2849  ;;  %v2840_v46 = vpop.permute.xlu0 %2839  ;;  %v2346_v32 = vpack.c.bf16 %v518_v41, %v516_v40  ;;  %v2348_v47 = vpack.c.bf16 %v517_v43, %v515_v42  ;;  %v266_v43 = vld [vmem:[%s4010_s1] sm:$0xff] }
 0x140   : > { %v2842_v49 = vunpack.i.h.bf16 %v2840_v46  ;;  %v2841_v50 = vunpack.i.l.bf16 %v2840_v46  ;;  %v2852_v53 = vunpack.i.h.bf16 %v2850_v45  ;;  %v2851_v54 = vunpack.i.l.bf16 %v2850_v45 }
 0x141   : > { %2347 = vmatprep.subr.bf16.mxu0 %v2346_v32 }
 0x142   : > { %v419_v55 = vsel %vm418_vm0, %v2786_v48, %v2841_v50  ;;  %v420_v56 = vsel %vm418_vm0, %v2841_v50, %v2842_v49  ;;  %2349 = vmatpush1.bf16.msra.mxu0 %v2348_v47  ;;  %v444_v3 = vsel %vm4024_vm1, %v2791_v61, %v2851_v54  ;;  %v445_v5 = vsel %vm4024_vm1, %v2851_v54, %v2852_v53  ;;  %v656_v49 = vld [vmem:[#allocation4 + $0x8] sm:$0xff]  ;;  %v666_v53 = vld [vmem:[#allocation4 + $0x58] sm:$0xff]  ;;  %v655_v54 = vld [vmem:[#allocation4] sm:$0xff] }
 0x143   : > { %v2350_v57 = vpack.c.bf16 %v422_v52, %v420_v56  ;;  %v2353_v58 = vpack.c.bf16 %v421_v51, %v419_v55  ;;  %v2865_v59 = vpop.permute.xlu1 %2864  ;;  %v2855_v60 = vpop.permute.xlu0 %2854  ;;  %v664_v50 = vld [vmem:[#allocation4 + $0x48] sm:$0xff]  ;;  %v658_v51 = vld [vmem:[#allocation4 + $0x18] sm:$0xff]  ;;  %v663_v55 = vld [vmem:[#allocation4 + $0x40] sm:$0xff] }
 0x144   : > { %v2857_v62 = vunpack.i.h.bf16 %v2855_v60  ;;  %v2856_v63 = vunpack.i.l.bf16 %v2855_v60  ;;  %v2867_v1 = vunpack.i.h.bf16 %v2865_v59  ;;  %v2866_v2 = vunpack.i.l.bf16 %v2865_v59  ;;  %v665_v59 = vld [vmem:[#allocation4 + $0x50] sm:$0xff]  ;;  %v672_v60 = vld [vmem:[#allocation4 + $0x88] sm:$0xff] }
 0x145   : > { %2352 = vmatprep.subr.msk.bf16.mxu0 %vm3264_vm13, %v2350_v57  ;;  %v2372_v52 = vpack.c.bf16 %v664_v50, %v656_v49  ;;  %v2436_v56 = vpack.c.bf16 %v666_v53, %v658_v51  ;;  %v2374_v57 = vpack.c.bf16 %v663_v55, %v655_v54  ;;  %v680_v61 = vld [vmem:[#allocation4 + $0xc8] sm:$0xff]  ;;  %v729_v50 = vld [vmem:[#allocation4 + $0x250] sm:$0xff]  ;;  %v738_v53 = vld [vmem:[#allocation4 + $0x298] sm:$0xff] }
 0x146   : > { %v446_v8 = vsel %vm4024_vm1, %v2792_v35, %v2856_v63  ;;  %v447_v9 = vsel %vm4024_vm1, %v2856_v63, %v2857_v62  ;;  %2355 = vmatpush1.bf16.msk.msra.mxu0 %vm3271_vm14, %v2353_v58  ;;  %v539_v19 = vsel %vm4022_vm2, %v2866_v2, %v2867_v1  ;;  %v538_v20 = vsel %vm4022_vm2, %v2797_v34, %v2866_v2  ;;  %v657_v58 = vld [vmem:[#allocation4 + $0x10] sm:$0xff]  ;;  %v674_v62 = vld [vmem:[#allocation4 + $0x98] sm:$0xff]  ;;  %v736_v51 = vld [vmem:[#allocation4 + $0x288] sm:$0xff] }
 0x147   : > { %v2356_v10 = vpack.c.bf16 %v447_v9, %v445_v5  ;;  %v2359_v11 = vpack.c.bf16 %v446_v8, %v444_v3  ;;  %v2870_v13 = vpop.permute.xlu1 %2869  ;;  %v2860_v14 = vpop.permute.xlu0 %2859  ;;  %2373 = vmatprep.subr.bf16.mxu1 %v2372_v52  ;;  %v2438_v35 = vpack.c.bf16 %v665_v59, %v657_v58  ;;  %v682_v63 = vld [vmem:[#allocation4 + $0xd8] sm:$0xff]  ;;  %v2376_v1 = vpack.c.bf16 %v680_v61, %v672_v60  ;;  %v671_v3 = vld [vmem:[#allocation4 + $0x80] sm:$0xff]  ;;  %v673_v8 = vld [vmem:[#allocation4 + $0x90] sm:$0xff] }
 0x148   : > { %v2862_v17 = vunpack.i.h.bf16 %v2860_v14  ;;  %v2861_v18 = vunpack.i.l.bf16 %v2860_v14  ;;  %v2872_v22 = vunpack.i.h.bf16 %v2870_v13  ;;  %v2871_v23 = vunpack.i.l.bf16 %v2870_v13  ;;  %2375 = vmatpush1.bf16.msra.mxu1 %v2374_v57  ;;  %v679_v5 = vld [vmem:[#allocation4 + $0xc0] sm:$0xff]  ;;  %v681_v34 = vld [vmem:[#allocation4 + $0xd0] sm:$0xff]  ;;  %v744_v52 = vld [vmem:[#allocation4 + $0x2c8] sm:$0xff] }
 0x149   : > { %2358 = vmatprep.subr.msk.bf16.mxu0 %vm3197_vm4, %v2356_v10  ;;  %v2440_v2 = vpack.c.bf16 %v682_v63, %v674_v62  ;;  %v2378_v9 = vpack.c.bf16 %v679_v5, %v671_v3  ;;  %v688_v10 = vld [vmem:[#allocation4 + $0x108] sm:$0xff]  ;;  %2377 = vmatprep.subr.bf16.mxu1 %v2376_v1  ;;  %v2442_v13 = vpack.c.bf16 %v681_v34, %v673_v8  ;;  %v746_v54 = vld [vmem:[#allocation4 + $0x2d8] sm:$0xff]  ;;  %v735_v58 = vld [vmem:[#allocation4 + $0x280] sm:$0xff]  ;;  %vm1196_vm4 = vcmask 269312  }
 0x14a   : > { %2361 = vmatpush1.bf16.msk.msra.mxu0 %vm3205_vm6, %v2359_v11  ;;  %v537_v24 = vsel %vm4022_vm2, %v2861_v18, %v2862_v17  ;;  %v536_v25 = vsel %vm4022_vm2, %v2796_v15, %v2861_v18  ;;  %v470_v38 = vsel %vm4020_vm3, %v2871_v23, %v2872_v22  ;;  %v696_v11 = vld [vmem:[#allocation4 + $0x148] sm:$0xff]  ;;  %v690_v15 = vld [vmem:[#allocation4 + $0x118] sm:$0xff]  ;;  %v687_v18 = vld [vmem:[#allocation4 + $0x100] sm:$0xff]  ;;  %v2392_v57 = vpack.c.bf16 %v744_v52, %v736_v51 }
 0x14b   : > { %v2880_v37 = vpop.permute.xlu1 %2879  ;;  %v2875_v26 = vpop.permute.xlu0 %2874  ;;  %v2362_v27 = vpack.c.bf16 %v539_v19, %v537_v24  ;;  %v2364_v30 = vpack.c.bf16 %v538_v20, %v536_v25  ;;  %v2380_v14 = vpack.c.bf16 %v696_v11, %v688_v10  ;;  %v698_v17 = vld [vmem:[#allocation4 + $0x158] sm:$0xff]  ;;  %v695_v20 = vld [vmem:[#allocation4 + $0x140] sm:$0xff]  ;;  %v689_v22 = vld [vmem:[#allocation4 + $0x110] sm:$0xff]  ;;  %1197 = vst.msk [vmem:[#allocation3] sm:$0xff] %vm1196_vm4, %v3075_v0  ;;  %vm1240_vm6 = vcmask 1047816  }
 0x14c   : > { %v2882_v16 = vunpack.i.h.bf16 %v2880_v37  ;;  %v2881_v31 = vunpack.i.l.bf16 %v2880_v37  ;;  %v2877_v33 = vunpack.i.h.bf16 %v2875_v26  ;;  %v2876_v36 = vunpack.i.l.bf16 %v2875_v26  ;;  %2379 = vmatpush1.bf16.msra.mxu1 %v2378_v9  ;;  %v704_v25 = vld [vmem:[#allocation4 + $0x188] sm:$0xff]  ;;  %v706_v26 = vld [vmem:[#allocation4 + $0x198] sm:$0xff]  ;;  %v743_v59 = vld [vmem:[#allocation4 + $0x2c0] sm:$0xff] }
 0x14d   : > { %2363 = vmatprep.subr.bf16.mxu0 %v2362_v27  ;;  %v2444_v19 = vpack.c.bf16 %v698_v17, %v690_v15  ;;  %v2382_v24 = vpack.c.bf16 %v695_v20, %v687_v18  ;;  %v712_v37 = vld [vmem:[#allocation4 + $0x1c8] sm:$0xff]  ;;  %2381 = vmatprep.subr.bf16.mxu1 %v2380_v14  ;;  %v737_v60 = vld [vmem:[#allocation4 + $0x290] sm:$0xff]  ;;  %v754_v1 = vld [vmem:[#allocation4 + $0x318] sm:$0xff]  ;;  %v2394_v3 = vpack.c.bf16 %v743_v59, %v735_v58 }
 0x14e   : > { %v469_v39 = vsel %vm4020_vm3, %v2881_v31, %v2871_v23  ;;  %v471_v21 = vsel %vm4020_vm3, %v2882_v16, %v2876_v36  ;;  %v472_v40 = vsel %vm4020_vm3, %v2876_v36, %v2877_v33  ;;  %2365 = vmatpush1.bf16.msra.mxu0 %v2364_v30  ;;  %v697_v23 = vld [vmem:[#allocation4 + $0x150] sm:$0xff]  ;;  %v2384_v30 = vpack.c.bf16 %v712_v37, %v704_v25  ;;  %v714_v16 = vld [vmem:[#allocation4 + $0x1d8] sm:$0xff]  ;;  %v703_v31 = vld [vmem:[#allocation4 + $0x180] sm:$0xff] }
 0x14f   : > { %v2366_v41 = vpack.c.bf16 %v472_v40, %v470_v38  ;;  %v2369_v42 = vpack.c.bf16 %v471_v21, %v469_v39  ;;  %v2446_v27 = vpack.c.bf16 %v697_v23, %v689_v22  ;;  %v711_v33 = vld [vmem:[#allocation4 + $0x1c0] sm:$0xff]  ;;  %v2448_v36 = vpack.c.bf16 %v714_v16, %v706_v26  ;;  %v705_v38 = vld [vmem:[#allocation4 + $0x190] sm:$0xff]  ;;  %v720_v21 = vld [vmem:[#allocation4 + $0x208] sm:$0xff] }
 0x150   : > { %v713_v39 = vld [vmem:[#allocation4 + $0x1d0] sm:$0xff]  ;;  %v728_v40 = vld [vmem:[#allocation4 + $0x248] sm:$0xff]  ;;  %2383 = vmatpush1.bf16.msra.mxu1 %v2382_v24  ;;  %v751_v9 = vld [vmem:[#allocation4 + $0x300] sm:$0xff] }
 0x151   : > { %2368 = vmatprep.subr.msk.bf16.mxu0 %vm3264_vm13, %v2366_v41  ;;  %v722_v41 = vld [vmem:[#allocation4 + $0x218] sm:$0xff]  ;;  %2385 = vmatprep.subr.bf16.mxu1 %v2384_v30  ;;  %v745_v61 = vld [vmem:[#allocation4 + $0x2d0] sm:$0xff]  ;;  %v752_v62 = vld [vmem:[#allocation4 + $0x308] sm:$0xff] }
 0x152   : > { %2371 = vmatpush1.bf16.msk.msra.mxu0 %vm3271_vm14, %v2369_v42  ;;  %v730_v42 = vld [vmem:[#allocation4 + $0x258] sm:$0xff]  ;;  %v760_v63 = vld [vmem:[#allocation4 + $0x348] sm:$0xff]  ;;  %v2458_v5 = vpack.c.bf16 %v745_v61, %v737_v60  ;;  %v759_v34 = vld [vmem:[#allocation4 + $0x340] sm:$0xff] }
 0x153   : > { %2437 = vmatprep.subr.bf16.mxu0 %v2436_v56  ;;  %v2452_v49 = vpack.c.bf16 %v730_v42, %v722_v41  ;;  %v2454_v56 = vpack.c.bf16 %v729_v50, %v721_v4  ;;  %v2396_v8 = vpack.c.bf16 %v760_v63, %v752_v62  ;;  %v753_v10 = vld [vmem:[#allocation4 + $0x310] sm:$0xff]  ;;  %v768_v14 = vld [vmem:[#allocation4 + $0x388] sm:$0xff]  ;;  %v770_v17 = vld [vmem:[#allocation4 + $0x398] sm:$0xff] }
 0x154   : > { %v776_v15 = vld [vmem:[#allocation4 + $0x3c8] sm:$0xff]  ;;  %v778_v18 = vld [vmem:[#allocation4 + $0x3d8] sm:$0xff]  ;;  %v767_v23 = vld [vmem:[#allocation4 + $0x380] sm:$0xff] }
 0x155   : > { %618 = vmatmul.mubr.f32.vlgmr.msra.gmra.mrb[0].mxu0 %v266_v43  ;;  %v2386_v43 = vpack.c.bf16 %v711_v33, %v703_v31  ;;  %v2400_v22 = vpack.c.bf16 %v776_v15, %v768_v14  ;;  %v775_v24 = vld [vmem:[#allocation4 + $0x3c0] sm:$0xff]  ;;  %v769_v25 = vld [vmem:[#allocation4 + $0x390] sm:$0xff]  ;;  %v2464_v37 = vpack.c.bf16 %v778_v18, %v770_v17  ;;  %v792_v30 = vld [vmem:[#allocation4 + $0x448] sm:$0xff] }
 0x156   : > { %2439 = vmatpush1.bf16.msra.mxu0 %v2438_v35  ;;  %v2456_v35 = vpack.c.bf16 %v746_v54, %v738_v53  ;;  %v777_v26 = vld [vmem:[#allocation4 + $0x3d0] sm:$0xff]  ;;  %v786_v16 = vld [vmem:[#allocation4 + $0x418] sm:$0xff]  ;;  %v2402_v33 = vpack.c.bf16 %v775_v24, %v767_v23  ;;  %v799_v50 = vld [vmem:[#allocation4 + $0x480] sm:$0xff] }
 0x157   : > { %2441 = vmatprep.subr.bf16.mxu0 %v2440_v2  ;;  %2387 = vmatpush1.bf16.msra.mxu1 %v2386_v43  ;;  %v762_v2 = vld [vmem:[#allocation4 + $0x358] sm:$0xff]  ;;  %v793_v42 = vld [vmem:[#allocation4 + $0x450] sm:$0xff]  ;;  %v800_v43 = vld [vmem:[#allocation4 + $0x488] sm:$0xff] }
 0x158   : > { %v2460_v11 = vpack.c.bf16 %v762_v2, %v754_v1  ;;  %v794_v31 = vld [vmem:[#allocation4 + $0x458] sm:$0xff]  ;;  %v807_v51 = vld [vmem:[#allocation4 + $0x4c0] sm:$0xff]  ;;  %v801_v52 = vld [vmem:[#allocation4 + $0x490] sm:$0xff] }
 0x159   : > { %v2468_v41 = vpack.c.bf16 %v794_v31, %v786_v16  ;;  %v809_v54 = vld [vmem:[#allocation4 + $0x4d0] sm:$0xff]  ;;  %v826_v58 = vld [vmem:[#allocation4 + $0x558] sm:$0xff]  ;;  %v2410_v59 = vpack.c.bf16 %v807_v51, %v799_v50  ;;  %v840_v15 = vld [vmem:[#allocation4 + $0x5c8] sm:$0xff] }
 0x15a   : > { %2443 = vmatpush1.bf16.msra.mxu0 %v2442_v13  ;;  %v761_v13 = vld [vmem:[#allocation4 + $0x350] sm:$0xff]  ;;  %v2474_v60 = vpack.c.bf16 %v809_v54, %v801_v52  ;;  %v834_v17 = vld [vmem:[#allocation4 + $0x598] sm:$0xff]  ;;  %v888_v54 = vld [vmem:[#allocation4 + $0x748] sm:$0xff] }
 0x15b   : > { %2445 = vmatprep.subr.bf16.mxu0 %v2444_v19  ;;  %v2398_v19 = vpack.c.bf16 %v759_v34, %v751_v9  ;;  %v2462_v20 = vpack.c.bf16 %v761_v13, %v753_v10  ;;  %v815_v9 = vld [vmem:[#allocation4 + $0x500] sm:$0xff]  ;;  %v817_v10 = vld [vmem:[#allocation4 + $0x510] sm:$0xff]  ;;  %v842_v18 = vld [vmem:[#allocation4 + $0x5d8] sm:$0xff] }
 0x15c   : > { %v547_v44 = vpop.permute.xlu0 %546  ;;  %v823_v34 = vld [vmem:[#allocation4 + $0x540] sm:$0xff]  ;;  %v825_v13 = vld [vmem:[#allocation4 + $0x550] sm:$0xff]  ;;  %v858_v16 = vld [vmem:[#allocation4 + $0x658] sm:$0xff] }
 0x15d   : > { %v2478_v14 = vpack.c.bf16 %v825_v13, %v817_v10  ;;  %v833_v24 = vld [vmem:[#allocation4 + $0x590] sm:$0xff]  ;;  %v895_v10 = vld [vmem:[#allocation4 + $0x780] sm:$0xff] }
 0x15e   : > { %2447 = vmatpush1.bf16.msra.mxu0 %v2446_v27  ;;  %v784_v27 = vld [vmem:[#allocation4 + $0x408] sm:$0xff]  ;;  %v865_v50 = vld [vmem:[#allocation4 + $0x690] sm:$0xff] }
 0x15f   : > { %2449 = vmatprep.subr.bf16.mxu0 %v2448_v36  ;;  %v2466_v36 = vpack.c.bf16 %v777_v26, %v769_v25  ;;  %v841_v25 = vld [vmem:[#allocation4 + $0x5d0] sm:$0xff] }
 0x160   : > { %v2482_v26 = vpack.c.bf16 %v841_v25, %v833_v24  ;;  %v873_v51 = vld [vmem:[#allocation4 + $0x6d0] sm:$0xff] }
 0x228   : > { %v619_v45 = vpop.f32.mrb[0].mxu0 }
 0x229   : > { %v3326_v46 = vadd.f32 %v619_v45, %v547_v44  ;;  %v621_v32 = vpop.f32.mrb[1].mxu0  ;;  %v2388_v45 = vpack.c.bf16 %v728_v40, %v720_v21  ;;  %v791_v21 = vld [vmem:[#allocation4 + $0x440] sm:$0xff]  ;;  %v785_v40 = vld [vmem:[#allocation4 + $0x410] sm:$0xff] }
 0x22a   : > { %v3328_v47 = vadd.f32 %v621_v32, %v547_v44  ;;  %v2450_v44 = vpack.c.bf16 %v713_v39, %v705_v38  ;;  %v719_v32 = vld [vmem:[#allocation4 + $0x200] sm:$0xff]  ;;  %v2404_v38 = vpack.c.bf16 %v792_v30, %v784_v27  ;;  %v2470_v4 = vpack.c.bf16 %v793_v42, %v785_v40  ;;  %v856_v27 = vld [vmem:[#allocation4 + $0x648] sm:$0xff]  ;;  %v850_v30 = vld [vmem:[#allocation4 + $0x618] sm:$0xff] }
 0x22b   : > { %2389 = vmatprep.subr.bf16.mxu1 %v2388_v45  ;;  %v783_v39 = vld [vmem:[#allocation4 + $0x400] sm:$0xff]  ;;  %v802_v45 = vld [vmem:[#allocation4 + $0x498] sm:$0xff]  ;;  %v857_v40 = vld [vmem:[#allocation4 + $0x650] sm:$0xff] }
 0x22c   : > { %v624_v48 = vadd.f32 %v3328_v47, %v3326_v46  ;;  %2451 = vmatpush1.bf16.msra.mxu0 %v2450_v44  ;;  %v808_v44 = vld [vmem:[#allocation4 + $0x4c8] sm:$0xff] }
 0x22d   : > { %2453 = vmatprep.subr.bf16.mxu0 %v2452_v49  ;;  %v2408_v49 = vpack.c.bf16 %v808_v44, %v800_v43  ;;  %v872_v42 = vld [vmem:[#allocation4 + $0x6c8] sm:$0xff] }
 0x22e   : > { %625 = vadd.xlane.f32.xlu1 %v624_v48  ;;  %v727_v48 = vld [vmem:[#allocation4 + $0x240] sm:$0xff] }
 0x22f   : > { %v2390_v55 = vpack.c.bf16 %v727_v48, %v719_v32  ;;  %v810_v32 = vld [vmem:[#allocation4 + $0x4d8] sm:$0xff]  ;;  %v2406_v48 = vpack.c.bf16 %v791_v21, %v783_v39  ;;  %v849_v39 = vld [vmem:[#allocation4 + $0x610] sm:$0xff] }
 0x230   : > { %2455 = vmatpush1.bf16.msra.mxu0 %v2454_v56  ;;  %v2472_v53 = vpack.c.bf16 %v810_v32, %v802_v45  ;;  %v824_v56 = vld [vmem:[#allocation4 + $0x548] sm:$0xff]  ;;  %v2486_v43 = vpack.c.bf16 %v857_v40, %v849_v39  ;;  %v866_v45 = vld [vmem:[#allocation4 + $0x698] sm:$0xff]  ;;  %v661_v39 = vld [vmem:[#allocation4 + $0x30] sm:$0xff] }
 0x231   : > { %2391 = vmatpush1.bf16.msra.mxu1 %v2390_v55  ;;  %2457 = vmatprep.subr.bf16.mxu0 %v2456_v35  ;;  %v816_v55 = vld [vmem:[#allocation4 + $0x508] sm:$0xff]  ;;  %v874_v32 = vld [vmem:[#allocation4 + $0x6d8] sm:$0xff] }
 0x232   : > { %2393 = vmatprep.subr.bf16.mxu1 %v2392_v57  ;;  %v818_v57 = vld [vmem:[#allocation4 + $0x518] sm:$0xff]  ;;  %v2412_v35 = vpack.c.bf16 %v824_v56, %v816_v55  ;;  %v2490_v56 = vpack.c.bf16 %v873_v51, %v865_v50  ;;  %v677_v50 = vld [vmem:[#allocation4 + $0xb0] sm:$0xff] }
 0x233   : > { %v2476_v61 = vpack.c.bf16 %v826_v58, %v818_v57  ;;  %v882_v55 = vld [vmem:[#allocation4 + $0x718] sm:$0xff]  ;;  %v879_v58 = vld [vmem:[#allocation4 + $0x700] sm:$0xff]  ;;  %v685_v51 = vld [vmem:[#allocation4 + $0xf0] sm:$0xff] }
 0x234   : > { %2459 = vmatpush1.bf16.msra.mxu0 %v2458_v5  ;;  %v890_v57 = vld [vmem:[#allocation4 + $0x758] sm:$0xff] }
 0x235   : > { %2395 = vmatpush1.bf16.msra.mxu1 %v2394_v3  ;;  %2461 = vmatprep.subr.bf16.mxu0 %v2460_v11  ;;  %v2414_v11 = vpack.c.bf16 %v823_v34, %v815_v9  ;;  %v906_v34 = vld [vmem:[#allocation4 + $0x7d8] sm:$0xff] }
 0x236   : > { %2397 = vmatprep.subr.bf16.mxu1 %v2396_v8 }
 0x238   : > { %2463 = vmatpush1.bf16.msra.mxu0 %v2462_v20  ;;  %v839_v20 = vld [vmem:[#allocation4 + $0x5c0] sm:$0xff] }
 0x239   : > { %2399 = vmatpush1.bf16.msra.mxu1 %v2398_v19  ;;  %2465 = vmatprep.subr.bf16.mxu0 %v2464_v37  ;;  %v831_v19 = vld [vmem:[#allocation4 + $0x580] sm:$0xff]  ;;  %v848_v37 = vld [vmem:[#allocation4 + $0x608] sm:$0xff] }
 0x23a   : > { %2401 = vmatprep.subr.bf16.mxu1 %v2400_v22  ;;  %v2480_v22 = vpack.c.bf16 %v842_v18, %v834_v17  ;;  %v2418_v23 = vpack.c.bf16 %v839_v20, %v831_v19  ;;  %v2420_v31 = vpack.c.bf16 %v856_v27, %v848_v37  ;;  %v660_v17 = vld [vmem:[#allocation4 + $0x28] sm:$0xff]  ;;  %v662_v18 = vld [vmem:[#allocation4 + $0x38] sm:$0xff] }
 0x23b   : > { %v670_v20 = vld [vmem:[#allocation4 + $0x78] sm:$0xff] }
 0x23c   : > { %2467 = vmatpush1.bf16.msra.mxu0 %v2466_v36  ;;  %v847_v36 = vld [vmem:[#allocation4 + $0x600] sm:$0xff] }
 0x23d   : > { %2403 = vmatpush1.bf16.msra.mxu1 %v2402_v33  ;;  %2469 = vmatprep.subr.bf16.mxu0 %v2468_v41  ;;  %v2484_v33 = vpack.c.bf16 %v858_v16, %v850_v30  ;;  %v864_v41 = vld [vmem:[#allocation4 + $0x688] sm:$0xff] }
 0x23e   : > { %2405 = vmatprep.subr.bf16.mxu1 %v2404_v38  ;;  %v855_v38 = vld [vmem:[#allocation4 + $0x640] sm:$0xff]  ;;  %v2424_v44 = vpack.c.bf16 %v872_v42, %v864_v41  ;;  %v676_v42 = vld [vmem:[#allocation4 + $0xa8] sm:$0xff] }
 0x23f   : > { %642 = vperm.xlu1 %2884, %v3237_v29   ;;  %v2422_v21 = vpack.c.bf16 %v855_v38, %v847_v36  ;;  %v659_v36 = vld [vmem:[#allocation4 + $0x20] sm:$0xff] }
 0x240   : > { %2471 = vmatpush1.bf16.msra.mxu0 %v2470_v4  ;;  %v2488_v4 = vpack.c.bf16 %v874_v32, %v866_v45  ;;  %v667_v38 = vld [vmem:[#allocation4 + $0x60] sm:$0xff]  ;;  %v686_v45 = vld [vmem:[#allocation4 + $0xf8] sm:$0xff] }
 0x241   : > { %2407 = vmatpush1.bf16.msra.mxu1 %v2406_v48  ;;  %2473 = vmatprep.subr.bf16.mxu0 %v2472_v53  ;;  %v863_v48 = vld [vmem:[#allocation4 + $0x680] sm:$0xff]  ;;  %v880_v53 = vld [vmem:[#allocation4 + $0x708] sm:$0xff] }
 0x242   : > { %2409 = vmatprep.subr.bf16.mxu1 %v2408_v49  ;;  %v871_v49 = vld [vmem:[#allocation4 + $0x6c0] sm:$0xff] }
 0x243   : > { %v2426_v52 = vpack.c.bf16 %v871_v49, %v863_v48  ;;  %v675_v49 = vld [vmem:[#allocation4 + $0xa0] sm:$0xff] }
 0x244   : > { %2475 = vmatpush1.bf16.msra.mxu0 %v2474_v60  ;;  %v2492_v60 = vpack.c.bf16 %v890_v57, %v882_v55  ;;  %v700_v55 = vld [vmem:[#allocation4 + $0x168] sm:$0xff] }
 0x245   : > { %2411 = vmatpush1.bf16.msra.mxu1 %v2410_v59  ;;  %2477 = vmatprep.subr.bf16.mxu0 %v2476_v61  ;;  %v887_v59 = vld [vmem:[#allocation4 + $0x740] sm:$0xff]  ;;  %v889_v61 = vld [vmem:[#allocation4 + $0x750] sm:$0xff] }
 0x246   : > { %2413 = vmatprep.subr.bf16.mxu1 %v2412_v35  ;;  %v881_v35 = vld [vmem:[#allocation4 + $0x710] sm:$0xff] }
 0x248   : > { %2479 = vmatpush1.bf16.msra.mxu0 %v2478_v14 }
 0x249   : > { %2415 = vmatpush1.bf16.msra.mxu1 %v2414_v11  ;;  %2481 = vmatprep.subr.bf16.mxu0 %v2480_v22  ;;  %v903_v11 = vld [vmem:[#allocation4 + $0x7c0] sm:$0xff]  ;;  %v2564_v22 = vpack.c.bf16 %v670_v20, %v662_v18  ;;  %v726_v18 = vld [vmem:[#allocation4 + $0x238] sm:$0xff] }
 0x24a   : > { %v2434_v14 = vpack.c.bf16 %v903_v11, %v895_v10  ;;  %v707_v11 = vld [vmem:[#allocation4 + $0x1a0] sm:$0xff] }
 0x24c   : > { %2483 = vmatpush1.bf16.msra.mxu0 %v2482_v26 }
 0x24d   : > { %2485 = vmatprep.subr.bf16.mxu0 %v2484_v33 }
 0x250   : > { %2487 = vmatpush1.bf16.msra.mxu0 %v2486_v43  ;;  %v684_v43 = vld [vmem:[#allocation4 + $0xe8] sm:$0xff] }
 0x251   : > { %2489 = vmatprep.subr.bf16.mxu0 %v2488_v4  ;;  %v2502_v4 = vpack.c.bf16 %v667_v38, %v659_v36 }
 0x254   : > { %2491 = vmatpush1.bf16.msra.mxu0 %v2490_v56  ;;  %v694_v56 = vld [vmem:[#allocation4 + $0x138] sm:$0xff] }
 0x255   : > { %2493 = vmatprep.subr.bf16.mxu0 %v2492_v60  ;;  %v699_v60 = vld [vmem:[#allocation4 + $0x160] sm:$0xff] }
 0x2bb   : > { %v626_v62 = vpop.xlane.xlu1 %625 }
 0x2bc   : > { %v628_v63 = vmul.f32 0.00390625, %v626_v62  ;;  %v2430_v62 = vpack.c.bf16 %v887_v59, %v879_v58  ;;  %v2570_v58 = vpack.c.bf16 %v685_v51, %v677_v50  ;;  %v691_v59 = vld [vmem:[#allocation4 + $0x120] sm:$0xff] }
 0x2bd   : > { %v763_v50 = vld [vmem:[#allocation4 + $0x360] sm:$0xff] }
 0x2be   : > { %v3335_v1 = vsub.f32 %v3326_v46, %v628_v63  ;;  %v3338_v2 = vsub.f32 %v3328_v47, %v628_v63  ;;  %v832_v46 = vld [vmem:[#allocation4 + $0x588] sm:$0xff]  ;;  %v2494_v63 = vpack.c.bf16 %v889_v61, %v881_v35 }
 0x2bf   : > { %v2416_v47 = vpack.c.bf16 %v840_v15, %v832_v46  ;;  %v897_v46 = vld [vmem:[#allocation4 + $0x790] sm:$0xff]  ;;  %v643_v26 = vpop.permute.xlu1 %642 }
 0x2c0   : > { %v631_v3 = vmul.f32 %v3335_v1, %v3335_v1  ;;  %v632_v5 = vmul.f32 %v3338_v2, %v3338_v2  ;;  %2495 = vmatpush1.bf16.msra.mxu0 %v2494_v63  ;;  %v905_v15 = vld [vmem:[#allocation4 + $0x7d0] sm:$0xff] }
 0x2c1   : > { %2417 = vmatprep.subr.bf16.mxu1 %v2416_v47  ;;  %v668_v47 = vld [vmem:[#allocation4 + $0x68] sm:$0xff]  ;;  %v701_v63 = vld [vmem:[#allocation4 + $0x170] sm:$0xff] }
 0x2c2   : > { %v633_v8 = vadd.f32 %v632_v5, %v631_v3  ;;  %2419 = vmatpush1.bf16.msra.mxu1 %v2418_v23  ;;  %v896_v3 = vld [vmem:[#allocation4 + $0x788] sm:$0xff]  ;;  %v2500_v19 = vpack.c.bf16 %v668_v47, %v660_v17 }
 0x2c3   : > { %2421 = vmatprep.subr.bf16.mxu1 %v2420_v31  ;;  %v904_v5 = vld [vmem:[#allocation4 + $0x7c8] sm:$0xff] }
 0x2c4   : > { %634 = vadd.xlane.f32.xlu0 %v633_v8  ;;  %v898_v8 = vld [vmem:[#allocation4 + $0x798] sm:$0xff]  ;;  %v2432_v9 = vpack.c.bf16 %v904_v5, %v896_v3  ;;  %v708_v3 = vld [vmem:[#allocation4 + $0x1a8] sm:$0xff] }
 0x2c5   : > { %v2496_v13 = vpack.c.bf16 %v906_v34, %v898_v8  ;;  %v716_v5 = vld [vmem:[#allocation4 + $0x1e8] sm:$0xff]  ;;  %v710_v8 = vld [vmem:[#allocation4 + $0x1b8] sm:$0xff]  ;;  %v2510_v34 = vpack.c.bf16 %v699_v60, %v691_v59  ;;  %v771_v60 = vld [vmem:[#allocation4 + $0x3a0] sm:$0xff] }
 0x2c6   : > { %2423 = vmatpush1.bf16.msra.mxu1 %v2422_v21  ;;  %v669_v21 = vld [vmem:[#allocation4 + $0x70] sm:$0xff]  ;;  %v724_v17 = vld [vmem:[#allocation4 + $0x228] sm:$0xff] }
 0x2c7   : > { %2425 = vmatprep.subr.bf16.mxu1 %v2424_v44  ;;  %2497 = vmatprep.subr.bf16.mxu0 %v2496_v13  ;;  %v678_v44 = vld [vmem:[#allocation4 + $0xb8] sm:$0xff]  ;;  %v715_v13 = vld [vmem:[#allocation4 + $0x1e0] sm:$0xff]  ;;  %v732_v47 = vld [vmem:[#allocation4 + $0x268] sm:$0xff] }
 0x2c8   : > { %v2514_v20 = vpack.c.bf16 %v715_v13, %v707_v11  ;;  %v787_v13 = vld [vmem:[#allocation4 + $0x420] sm:$0xff] }
 0x2ca   : > { %2427 = vmatpush1.bf16.msra.mxu1 %v2426_v52  ;;  %v692_v52 = vld [vmem:[#allocation4 + $0x128] sm:$0xff] }
 0x2cb   : > { %v2508_v35 = vpack.c.bf16 %v700_v55, %v692_v52  ;;  %v772_v55 = vld [vmem:[#allocation4 + $0x3a8] sm:$0xff] }
 0x2da   : > { %648 = vperm.xlu0 %2885, %v3237_v29   ;;  %v2428_v29 = vpack.c.bf16 %v888_v54, %v880_v53  ;;  %v2504_v53 = vpack.c.bf16 %v684_v43, %v676_v42  ;;  %v2568_v54 = vpack.c.bf16 %v686_v45, %v678_v44  ;;  %v741_v42 = vld [vmem:[#allocation4 + $0x2b0] sm:$0xff]  ;;  %v756_v44 = vld [vmem:[#allocation4 + $0x328] sm:$0xff] }
 0x2db   : > { %v749_v43 = vld [vmem:[#allocation4 + $0x2f0] sm:$0xff]  ;;  %v764_v45 = vld [vmem:[#allocation4 + $0x368] sm:$0xff] }
 0x2dc   : > { %2429 = vmatprep.subr.bf16.mxu1 %v2428_v29  ;;  %v702_v29 = vld [vmem:[#allocation4 + $0x178] sm:$0xff]  ;;  %v2524_v51 = vpack.c.bf16 %v764_v45, %v756_v44  ;;  %v829_v44 = vld [vmem:[#allocation4 + $0x570] sm:$0xff]  ;;  %v836_v45 = vld [vmem:[#allocation4 + $0x5a8] sm:$0xff] }
 0x2dd   : > { %2431 = vmatpush1.bf16.msra.mxu1 %v2430_v62  ;;  %v2572_v61 = vpack.c.bf16 %v702_v29, %v694_v56  ;;  %v693_v62 = vld [vmem:[#allocation4 + $0x130] sm:$0xff]  ;;  %v780_v56 = vld [vmem:[#allocation4 + $0x3e8] sm:$0xff]  ;;  %v774_v29 = vld [vmem:[#allocation4 + $0x3b8] sm:$0xff] }
 0x2de   : > { %3026 = vset.pattern.permute.xlu0 %v3085_v28  ;;  %2433 = vmatprep.subr.bf16.mxu1 %v2432_v9  ;;  %v2498_v28 = vpack.c.bf16 %v905_v15, %v897_v46  ;;  %v718_v9 = vld [vmem:[#allocation4 + $0x1f8] sm:$0xff]  ;;  %v2574_v10 = vpack.c.bf16 %v701_v63, %v693_v62  ;;  %v709_v15 = vld [vmem:[#allocation4 + $0x1b0] sm:$0xff] }
 0x2df   : > { %v2576_v46 = vpack.c.bf16 %v718_v9, %v710_v8  ;;  %v773_v63 = vld [vmem:[#allocation4 + $0x3b0] sm:$0xff]  ;;  %v796_v8 = vld [vmem:[#allocation4 + $0x468] sm:$0xff]  ;;  %v790_v9 = vld [vmem:[#allocation4 + $0x438] sm:$0xff] }
 0x2e0   : > { %2499 = vmatpush1.bf16.msra.mxu0 %v2498_v28  ;;  %v717_v28 = vld [vmem:[#allocation4 + $0x1f0] sm:$0xff] }
 0x2e1   : > { %2435 = vmatpush1.bf16.msra.mxu1 %v2434_v14  ;;  %2565 = vmatprep.subr.bf16.mxu0 %v2564_v22  ;;  %v2512_v14 = vpack.c.bf16 %v716_v5, %v708_v3  ;;  %v2578_v22 = vpack.c.bf16 %v717_v28, %v709_v15  ;;  %v781_v3 = vld [vmem:[#allocation4 + $0x3f0] sm:$0xff]  ;;  %v788_v5 = vld [vmem:[#allocation4 + $0x428] sm:$0xff] }
 0x2e2   : > { %2501 = vmatprep.subr.bf16.mxu1 %v2500_v19  ;;  %v734_v19 = vld [vmem:[#allocation4 + $0x278] sm:$0xff]  ;;  %v2594_v11 = vpack.c.bf16 %v781_v3, %v773_v63  ;;  %v789_v28 = vld [vmem:[#allocation4 + $0x430] sm:$0xff] }
 0x2e3   : > { %v853_v3 = vld [vmem:[#allocation4 + $0x630] sm:$0xff] }
 0x351   : > { %v635_v23 = vpop.xlane.xlu0 %634 }
 0x352   : > { %v636_v24 = vmul.f32 0.00390625, %v635_v23  ;;  %v723_v23 = vld [vmem:[#allocation4 + $0x220] sm:$0xff] }
 0x354   : > { %v637_v25 = vadd.f32 1e-05, %v636_v24  ;;  %v731_v24 = vld [vmem:[#allocation4 + $0x260] sm:$0xff] }
 0x355   : > { %v2518_v36 = vpack.c.bf16 %v731_v24, %v723_v23  ;;  %v803_v24 = vld [vmem:[#allocation4 + $0x4a0] sm:$0xff] }
 0x356   : > { %3028 = vrsqrt.f32 %v637_v25  ;;  %v2516_v25 = vpack.c.bf16 %v732_v47, %v724_v17  ;;  %v797_v17 = vld [vmem:[#allocation4 + $0x470] sm:$0xff]  ;;  %v804_v47 = vld [vmem:[#allocation4 + $0x4a8] sm:$0xff] }
 0x357   : > { %v2598_v23 = vpack.c.bf16 %v797_v17, %v789_v28  ;;  %v869_v17 = vld [vmem:[#allocation4 + $0x6b0] sm:$0xff] }
 0x359   : > { %v649_v16 = vpop.permute.xlu0 %648 }
 0x360   : > { %v3029_v37 = vpop.eup %3028 }
 0x361   : > { %v639_v27 = vmul.f32 %v3029_v37, %v3335_v1  ;;  %v640_v30 = vmul.f32 %v3029_v37, %v3338_v2  ;;  %v2566_v1 = vpack.c.bf16 %v669_v21, %v661_v39  ;;  %v683_v2 = vld [vmem:[#allocation4 + $0xe0] sm:$0xff]  ;;  %v2580_v37 = vpack.c.bf16 %v734_v19, %v726_v18  ;;  %v812_v18 = vld [vmem:[#allocation4 + $0x4e8] sm:$0xff]  ;;  %v806_v19 = vld [vmem:[#allocation4 + $0x4b8] sm:$0xff] }
 0x362   : > { %v2506_v57 = vpack.c.bf16 %v683_v2, %v675_v49  ;;  %v739_v39 = vld [vmem:[#allocation4 + $0x2a0] sm:$0xff]  ;;  %v2586_v49 = vpack.c.bf16 %v749_v43, %v741_v42  ;;  %v821_v43 = vld [vmem:[#allocation4 + $0x530] sm:$0xff] }
 0x363   : > { %v645_v31 = vmul.f32 %v643_v26, %v639_v27  ;;  %v646_v33 = vmul.f32 %v643_v26, %v640_v30  ;;  %v725_v26 = vld [vmem:[#allocation4 + $0x230] sm:$0xff]  ;;  %v740_v30 = vld [vmem:[#allocation4 + $0x2a8] sm:$0xff]  ;;  %v747_v21 = vld [vmem:[#allocation4 + $0x2e0] sm:$0xff] }
 0x364   : > { %v733_v27 = vld [vmem:[#allocation4 + $0x270] sm:$0xff]  ;;  %v755_v2 = vld [vmem:[#allocation4 + $0x320] sm:$0xff] }
 0x365   : > { %v651_v40 = vadd.f32 %v649_v16, %v645_v31  ;;  %v652_v41 = vadd.f32 %v649_v16, %v646_v33  ;;  %v748_v16 = vld [vmem:[#allocation4 + $0x2e8] sm:$0xff]  ;;  %v742_v31 = vld [vmem:[#allocation4 + $0x2b8] sm:$0xff]  ;;  %v2582_v38 = vpack.c.bf16 %v733_v27, %v725_v26  ;;  %v805_v27 = vld [vmem:[#allocation4 + $0x4b0] sm:$0xff] }
 0x366   : > { %v750_v33 = vld [vmem:[#allocation4 + $0x2f8] sm:$0xff] }
 0x367   : > { %v3348_v32 = vmax.f32 %v651_v40, 0.0  ;;  %v654_v48 = vmax.f32 %v652_v41, 0.0  ;;  %v2520_v40 = vpack.c.bf16 %v748_v16, %v740_v30  ;;  %v2584_v41 = vpack.c.bf16 %v750_v33, %v742_v31  ;;  %v813_v30 = vld [vmem:[#allocation4 + $0x4f0] sm:$0xff]  ;;  %v820_v16 = vld [vmem:[#allocation4 + $0x528] sm:$0xff]  ;;  %v822_v33 = vld [vmem:[#allocation4 + $0x538] sm:$0xff] }
 0x368   : > { %v828_v31 = vld [vmem:[#allocation4 + $0x568] sm:$0xff] }
 0x369   : > { %975 = vmatprep.mubr.f32.mxu1 %v654_v48  ;;  %1046 = vmatprep.mubr.f32.mxu0 %v654_v48 }
 0x36a   : > { %976 = vmatmul.mubr.f32.vlgmr.msra.gmra.mrb[0].mxu1 %v3348_v32  ;;  %1047 = vmatmul.mubr.f32.vlgmr.msra.gmra.mrb[2].mxu0 %v3348_v32 }
 0x36b   : > { %2503 = vmatpush1.bf16.msra.mxu1 %v2502_v4  ;;  %2567 = vmatpush1.bf16.msra.mxu0 %v2566_v1  ;;  %v766_v4 = vld [vmem:[#allocation4 + $0x378] sm:$0xff]  ;;  %v2522_v1 = vpack.c.bf16 %v747_v21, %v739_v39  ;;  %v2602_v39 = vpack.c.bf16 %v813_v30, %v805_v27  ;;  %v819_v21 = vld [vmem:[#allocation4 + $0x520] sm:$0xff]  ;;  %v885_v30 = vld [vmem:[#allocation4 + $0x730] sm:$0xff] }
 0x36c   : > { %1117 = vmatprep.mubr.f32.mxu1 %v654_v48  ;;  %1188 = vmatprep.mubr.f32.mxu0 %v654_v48  ;;  %v758_v48 = vld [vmem:[#allocation4 + $0x338] sm:$0xff] }
 0x36d   : > { %2505 = vmatprep.subr.bf16.mxu1 %v2504_v53  ;;  %2569 = vmatprep.subr.bf16.mxu0 %v2568_v54  ;;  %v2588_v52 = vpack.c.bf16 %v766_v4, %v758_v48  ;;  %v757_v53 = vld [vmem:[#allocation4 + $0x330] sm:$0xff]  ;;  %v844_v48 = vld [vmem:[#allocation4 + $0x5e8] sm:$0xff]  ;;  %v838_v4 = vld [vmem:[#allocation4 + $0x5b8] sm:$0xff] }
 0x36e   : > { %v765_v54 = vld [vmem:[#allocation4 + $0x370] sm:$0xff] }
 0x36f   : > { %2507 = vmatpush1.bf16.msra.mxu1 %v2506_v57  ;;  %2571 = vmatpush1.bf16.msra.mxu0 %v2570_v58  ;;  %v782_v57 = vld [vmem:[#allocation4 + $0x3f8] sm:$0xff]  ;;  %v2526_v58 = vpack.c.bf16 %v763_v50, %v755_v2  ;;  %v2590_v59 = vpack.c.bf16 %v765_v54, %v757_v53  ;;  %v2606_v2 = vpack.c.bf16 %v829_v44, %v821_v43  ;;  %v835_v50 = vld [vmem:[#allocation4 + $0x5a0] sm:$0xff]  ;;  %v837_v54 = vld [vmem:[#allocation4 + $0x5b0] sm:$0xff] }
 0x370   : > { %2509 = vmatprep.subr.bf16.mxu1 %v2508_v35  ;;  %2573 = vmatprep.subr.bf16.mxu0 %v2572_v61  ;;  %v779_v35 = vld [vmem:[#allocation4 + $0x3e0] sm:$0xff]  ;;  %v2528_v61 = vpack.c.bf16 %v780_v56, %v772_v55  ;;  %v2592_v62 = vpack.c.bf16 %v782_v57, %v774_v29  ;;  %v845_v55 = vld [vmem:[#allocation4 + $0x5f0] sm:$0xff]  ;;  %v852_v56 = vld [vmem:[#allocation4 + $0x628] sm:$0xff] }
 0x371   : > { %v860_v29 = vld [vmem:[#allocation4 + $0x668] sm:$0xff]  ;;  %v854_v57 = vld [vmem:[#allocation4 + $0x638] sm:$0xff]  ;;  %v907_v43 = vld [vmem:[#allocation4 + $0x7e0] sm:$0xff] }
 0x372   : > { %v901_v44 = vld [vmem:[#allocation4 + $0x7b0] sm:$0xff] }
 0x373   : > { %2511 = vmatpush1.bf16.msra.mxu1 %v2510_v34  ;;  %2575 = vmatpush1.bf16.msra.mxu0 %v2574_v10  ;;  %v798_v34 = vld [vmem:[#allocation4 + $0x478] sm:$0xff]  ;;  %v2530_v10 = vpack.c.bf16 %v779_v35, %v771_v60  ;;  %v2610_v60 = vpack.c.bf16 %v845_v55, %v837_v54  ;;  %v851_v35 = vld [vmem:[#allocation4 + $0x620] sm:$0xff] }
 0x374   : > { %2513 = vmatprep.subr.bf16.mxu1 %v2512_v14  ;;  %2577 = vmatprep.subr.bf16.mxu0 %v2576_v46  ;;  %v795_v14 = vld [vmem:[#allocation4 + $0x460] sm:$0xff]  ;;  %v2532_v46 = vpack.c.bf16 %v796_v8, %v788_v5  ;;  %v2596_v15 = vpack.c.bf16 %v798_v34, %v790_v9  ;;  %v861_v5 = vld [vmem:[#allocation4 + $0x670] sm:$0xff]  ;;  %v868_v8 = vld [vmem:[#allocation4 + $0x6a8] sm:$0xff] }
 0x375   : > { %v876_v9 = vld [vmem:[#allocation4 + $0x6e8] sm:$0xff]  ;;  %v870_v34 = vld [vmem:[#allocation4 + $0x6b8] sm:$0xff] }
 0x377   : > { %2515 = vmatpush1.bf16.msra.mxu1 %v2514_v20  ;;  %2579 = vmatpush1.bf16.msra.mxu0 %v2578_v22  ;;  %v814_v20 = vld [vmem:[#allocation4 + $0x4f8] sm:$0xff]  ;;  %v2534_v22 = vpack.c.bf16 %v795_v14, %v787_v13  ;;  %v2614_v13 = vpack.c.bf16 %v861_v5, %v853_v3  ;;  %v867_v14 = vld [vmem:[#allocation4 + $0x6a0] sm:$0xff] }
 0x378   : > { %2517 = vmatprep.subr.bf16.mxu1 %v2516_v25  ;;  %2581 = vmatprep.subr.bf16.mxu0 %v2580_v37  ;;  %v811_v25 = vld [vmem:[#allocation4 + $0x4e0] sm:$0xff]  ;;  %v2536_v37 = vpack.c.bf16 %v812_v18, %v804_v47  ;;  %v2600_v26 = vpack.c.bf16 %v814_v20, %v806_v19  ;;  %v877_v47 = vld [vmem:[#allocation4 + $0x6f0] sm:$0xff]  ;;  %v884_v18 = vld [vmem:[#allocation4 + $0x728] sm:$0xff] }
 0x379   : > { %v892_v19 = vld [vmem:[#allocation4 + $0x768] sm:$0xff]  ;;  %v886_v20 = vld [vmem:[#allocation4 + $0x738] sm:$0xff] }
 0x37b   : > { %2519 = vmatpush1.bf16.msra.mxu1 %v2518_v36  ;;  %2583 = vmatpush1.bf16.msra.mxu0 %v2582_v38  ;;  %v830_v36 = vld [vmem:[#allocation4 + $0x578] sm:$0xff]  ;;  %v2538_v38 = vpack.c.bf16 %v811_v25, %v803_v24  ;;  %v2618_v24 = vpack.c.bf16 %v877_v47, %v869_v17  ;;  %v883_v25 = vld [vmem:[#allocation4 + $0x720] sm:$0xff] }
 0x37c   : > { %2521 = vmatprep.subr.bf16.mxu1 %v2520_v40  ;;  %2585 = vmatprep.subr.bf16.mxu0 %v2584_v41  ;;  %v827_v40 = vld [vmem:[#allocation4 + $0x560] sm:$0xff]  ;;  %v2540_v41 = vpack.c.bf16 %v828_v31, %v820_v16  ;;  %v2604_v42 = vpack.c.bf16 %v830_v36, %v822_v33  ;;  %v893_v16 = vld [vmem:[#allocation4 + $0x770] sm:$0xff]  ;;  %v900_v31 = vld [vmem:[#allocation4 + $0x7a8] sm:$0xff] }
 0x37d   : > { %v908_v33 = vld [vmem:[#allocation4 + $0x7e8] sm:$0xff]  ;;  %v902_v36 = vld [vmem:[#allocation4 + $0x7b8] sm:$0xff] }
 0x37f   : > { %2523 = vmatpush1.bf16.msra.mxu1 %v2522_v1  ;;  %2587 = vmatpush1.bf16.msra.mxu0 %v2586_v49  ;;  %v846_v1 = vld [vmem:[#allocation4 + $0x5f8] sm:$0xff]  ;;  %v2542_v49 = vpack.c.bf16 %v827_v40, %v819_v21  ;;  %v2622_v21 = vpack.c.bf16 %v893_v16, %v885_v30  ;;  %v899_v40 = vld [vmem:[#allocation4 + $0x7a0] sm:$0xff] }
 0x380   : > { %2525 = vmatprep.subr.bf16.mxu1 %v2524_v51  ;;  %2589 = vmatprep.subr.bf16.mxu0 %v2588_v52  ;;  %v843_v51 = vld [vmem:[#allocation4 + $0x5e0] sm:$0xff]  ;;  %v2544_v52 = vpack.c.bf16 %v844_v48, %v836_v45  ;;  %v2608_v53 = vpack.c.bf16 %v846_v1, %v838_v4  ;;  %v909_v45 = vld [vmem:[#allocation4 + $0x7f0] sm:$0xff]  ;;  %v2562_v48 = vpack.c.bf16 %v907_v43, %v899_v40 }
 0x381   : > { %v2626_v4 = vpack.c.bf16 %v909_v45, %v901_v44 }
 0x383   : > { %2527 = vmatpush1.bf16.msra.mxu1 %v2526_v58  ;;  %2591 = vmatpush1.bf16.msra.mxu0 %v2590_v59  ;;  %v862_v58 = vld [vmem:[#allocation4 + $0x678] sm:$0xff]  ;;  %v2546_v59 = vpack.c.bf16 %v843_v51, %v835_v50 }
 0x384   : > { %2529 = vmatprep.subr.bf16.mxu1 %v2528_v61  ;;  %2593 = vmatprep.subr.bf16.mxu0 %v2592_v62  ;;  %v859_v61 = vld [vmem:[#allocation4 + $0x660] sm:$0xff]  ;;  %v2548_v62 = vpack.c.bf16 %v860_v29, %v852_v56  ;;  %v2612_v63 = vpack.c.bf16 %v862_v58, %v854_v57 }
 0x387   : > { %2531 = vmatpush1.bf16.msra.mxu1 %v2530_v10  ;;  %2595 = vmatpush1.bf16.msra.mxu0 %v2594_v11  ;;  %v878_v10 = vld [vmem:[#allocation4 + $0x6f8] sm:$0xff]  ;;  %v2550_v11 = vpack.c.bf16 %v859_v61, %v851_v35 }
 0x388   : > { %2533 = vmatprep.subr.bf16.mxu1 %v2532_v46  ;;  %2597 = vmatprep.subr.bf16.mxu0 %v2596_v15  ;;  %v875_v46 = vld [vmem:[#allocation4 + $0x6e0] sm:$0xff]  ;;  %v2552_v15 = vpack.c.bf16 %v876_v9, %v868_v8  ;;  %v2616_v28 = vpack.c.bf16 %v878_v10, %v870_v34 }
 0x38b   : > { %2535 = vmatpush1.bf16.msra.mxu1 %v2534_v22  ;;  %2599 = vmatpush1.bf16.msra.mxu0 %v2598_v23  ;;  %v894_v22 = vld [vmem:[#allocation4 + $0x778] sm:$0xff]  ;;  %v2554_v23 = vpack.c.bf16 %v875_v46, %v867_v14 }
 0x38c   : > { %2537 = vmatprep.subr.bf16.mxu1 %v2536_v37  ;;  %2601 = vmatprep.subr.bf16.mxu0 %v2600_v26  ;;  %v891_v37 = vld [vmem:[#allocation4 + $0x760] sm:$0xff]  ;;  %v2556_v26 = vpack.c.bf16 %v892_v19, %v884_v18  ;;  %v2620_v27 = vpack.c.bf16 %v894_v22, %v886_v20  ;;  %v1260_v19 = vand.u32 31, %v3184_v6 }
 0x38e   : > { %vm3464_vm12 = vcmp.ge.s32.totalorder %v1260_v19, 1  ;;  %vm3515_vm0 = vcmp.le.s32.totalorder %v1260_v19, 30 }
 0x38f   : > { %2539 = vmatpush1.bf16.msra.mxu1 %v2538_v38  ;;  %2603 = vmatpush1.bf16.msra.mxu0 %v2602_v39  ;;  %v910_v38 = vld [vmem:[#allocation4 + $0x7f8] sm:$0xff]  ;;  %v2558_v39 = vpack.c.bf16 %v891_v37, %v883_v25  ;;  %vm3483_vm13 = vmpackc.low %vm4026_vm10, %vm3464_vm12 }
 0x390   : > { %2541 = vmatprep.subr.bf16.mxu1 %v2540_v41  ;;  %2605 = vmatprep.subr.bf16.mxu0 %v2604_v42  ;;  %v2560_v41 = vpack.c.bf16 %v908_v33, %v900_v31  ;;  %v2624_v42 = vpack.c.bf16 %v910_v38, %v902_v36 }
 0x393   : > { %2543 = vmatpush1.bf16.msra.mxu1 %v2542_v49  ;;  %2607 = vmatpush1.bf16.msra.mxu0 %v2606_v2 }
 0x394   : > { %2545 = vmatprep.subr.bf16.mxu1 %v2544_v52  ;;  %2609 = vmatprep.subr.bf16.mxu0 %v2608_v53 }
 0x397   : > { %2547 = vmatpush1.bf16.msra.mxu1 %v2546_v59  ;;  %2611 = vmatpush1.bf16.msra.mxu0 %v2610_v60 }
 0x398   : > { %2549 = vmatprep.subr.bf16.mxu1 %v2548_v62  ;;  %2613 = vmatprep.subr.bf16.mxu0 %v2612_v63 }
 0x39b   : > { %2551 = vmatpush1.bf16.msra.mxu1 %v2550_v11  ;;  %2615 = vmatpush1.bf16.msra.mxu0 %v2614_v13 }
 0x39c   : > { %2553 = vmatprep.subr.bf16.mxu1 %v2552_v15  ;;  %2617 = vmatprep.subr.bf16.mxu0 %v2616_v28  ;;  %v1267_v28 = vand.u32 31, %v3187_v7 }
 0x39e   : > { %vm3446_vm7 = vcmp.ge.s32.totalorder %v1267_v28, 1  ;;  %vm3490_vm14 = vcmp.le.s32.totalorder %v1267_v28, 30 }
 0x39f   : > { %2555 = vmatpush1.bf16.msra.mxu1 %v2554_v23  ;;  %2619 = vmatpush1.bf16.msra.mxu0 %v2618_v24  ;;  %vm3457_vm11 = vmpackc.low %vm4026_vm10, %vm3446_vm7 }
 0x3a0   : > { %2557 = vmatprep.subr.bf16.mxu1 %v2556_v26  ;;  %2621 = vmatprep.subr.bf16.mxu0 %v2620_v27  ;;  %vm2635_vm15 = vmpackc.low %vm3446_vm7, %vm3490_vm14  ;;  %vm4021_vm7 = vcmask 523264  }
 0x3a1   : > { %vm2641_vm5 = vmpackc.low %vm3490_vm14, %vm4026_vm10 }
 0x3a3   : > { %2559 = vmatpush1.bf16.msra.mxu1 %v2558_v39  ;;  %2623 = vmatpush1.bf16.msra.mxu0 %v2622_v21 }
 0x3a4   : > { %2561 = vmatprep.subr.bf16.mxu1 %v2560_v41  ;;  %2625 = vmatprep.subr.bf16.mxu0 %v2624_v42  ;;  %v3495_v42 = vld [vmem:[%s3232_s6 + $0x8] sm:$0x7] }
 0x3a7   : > { %2563 = vmatpush1.bf16.msra.mxu1 %v2562_v48  ;;  %2627 = vmatpush1.bf16.msra.mxu0 %v2626_v4 }
 0x3aa   : > { %1118 = vmatmul.mubr.f32.vlgmr.msra.gmra.mrb[2].mxu1 %v3348_v32  ;;  %1189 = vmatmul.mubr.f32.vlgmr.msra.gmra.mrb[4].mxu0 %v3348_v32 }
 0x3ab   : > { %1814 = vmatprep.mubr.f32.mxu1 %v3075_v0  ;;  %1956 = vmatprep.mubr.f32.mxu0 %v3075_v0 }
 0x43d   : > { %v977_v1 = vpop.f32.mrb[0].mxu1  ;;  %v1048_v49 = vpop.f32.mrb[2].mxu0 }
 0x43e   : > { %v1050_v2 = vpop.f32.mrb[3].mxu0  ;;  %1208 = vrot.lane.b32.xlu1 %v977_v1, %s3088_s9  ;;  %v979_v50 = vpop.f32.mrb[1].mxu1 }
 0x442   : > { %1210 = vrot.lane.b32.xlu1 %v979_v50, %s3088_s9 }
 0x446   : > { %1212 = vrot.lane.b32.xlu1 %v1048_v49, %s3088_s9 }
 0x44a   : > { %1214 = vrot.lane.b32.xlu1 %v1050_v2, %s3088_s9 }
 0x47d   : > { %v1119_v32 = vpop.f32.mrb[2].mxu1  ;;  %v1190_v51 = vpop.f32.mrb[4].mxu0 }
 0x47e   : > { %v1192_v52 = vpop.f32.mrb[5].mxu0  ;;  %1216 = vrot.lane.b32.xlu1 %v1119_v32, %s3088_s9  ;;  %v1121_v53 = vpop.f32.mrb[3].mxu1 }
 0x482   : > { %1220 = vrot.lane.b32.xlu1 %v1190_v51, %s3088_s9  ;;  %v1250_v51 = vadd.s32 256, %v3184_v6 }
 0x486   : > { %1218 = vrot.lane.b32.xlu1 %v1121_v53, %s3088_s9 }
 0x48a   : > { %1222 = vrot.lane.b32.xlu1 %v1192_v52, %s3088_s9 }
 0x4b0   : > { %v1209_v54 = vpop.permute.xlu1 %1208 }
 0x4b1   : > { %1241 = vst.msk [vmem:[#allocation3] sm:$0xff] %vm1240_vm6, %v1209_v54  ;;  %vm2644_vm6 = vmpackc.low %vm3515_vm0, %vm4026_vm10 }
 0x4b4   : > { %v1211_v55 = vpop.permute.xlu1 %1210 }
 0x4b5   : > { %v3360_v56 = vsel %vm1196_vm4, %v1209_v54, %v1211_v55 }
 0x4b8   : > { %v1213_v29 = vpop.permute.xlu1 %1212  ;;  %v3362_v57 = vld [vmem:[#allocation3] sm:$0xff] }
 0x4b9   : > { %v3365_v58 = vsel %vm1196_vm4, %v1211_v55, %v1213_v29  ;;  %1595 = vrot.lane.b32.xlu1 %v3362_v57, %s3089_s10 }
 0x4ba   : > { %v2886_v59 = vpack.i.bf16 %v3365_v58, %v3360_v56 }
 0x4bc   : > { %v1215_v60 = vpop.permute.xlu1 %1214  ;;  %2887 = vrot.lane.b32.xlu0 %v2886_v59, %s3078_s17 }
 0x4bd   : > { %v3373_v35 = vsel %vm1196_vm4, %v1213_v29, %v1215_v60 }
 0x4be   : > { %v2891_v61 = vpack.i.bf16 %v3373_v35, %v3362_v57 }
 0x4c0   : > { %2897 = vrot.lane.b32.xlu0 %v2886_v59, %s3077_s16  ;;  %2892 = vrot.lane.b32.xlu1 %v2891_v61, %s3078_s17 }
 0x4c4   : > { %2907 = vrot.lane.b32.xlu0 %v2891_v61, %s3077_s16  ;;  %2902 = vrot.lane.b32.xlu1 %v2886_v59, %s3081_s22 }
 0x4c8   : > { %2917 = vrot.lane.b32.xlu0 %v2886_v59, %s3084_s27  ;;  %2912 = vrot.lane.b32.xlu1 %v2891_v61, %s3081_s22 }
 0x4cc   : > { %2927 = vrot.lane.b32.xlu0 %v2891_v61, %s3084_s27  ;;  %2922 = vrot.lane.b32.xlu1 %v2886_v59, %s3083_s24 }
 0x4d0   : > { %2937 = vrot.lane.b32.xlu0 %v2886_v59, %s3090_s12  ;;  %2932 = vrot.lane.b32.xlu1 %v2891_v61, %s3083_s24 }
 0x4d4   : > { %2947 = vrot.lane.b32.xlu0 %v2891_v61, %s3090_s12  ;;  %2942 = vrot.lane.b32.xlu1 %v2886_v59, %s3091_s13 }
 0x4d8   : > { %1597 = vrot.lane.b32.xlu0 %v3360_v56, %s3089_s10  ;;  %2952 = vrot.lane.b32.xlu1 %v2891_v61, %s3091_s13 }
 0x4dc   : > { %1599 = vrot.lane.b32.xlu1 %v3365_v58, %s3089_s10 }
 0x4e0   : > { %1601 = vrot.lane.b32.xlu1 %v3373_v35, %s3089_s10 }
 0x4f0   : > { %v1217_v62 = vpop.permute.xlu1 %1216 }
 0x4f1   : > { %v3397_v63 = vsel %vm1196_vm4, %v1215_v60, %v1217_v62 }
 0x4f2   : > { %1603 = vrot.lane.b32.xlu0 %v3397_v63, %s3089_s10  ;;  %1714 = vrot.lane.b32.xlu1 %v3397_v63, %s3091_s13 }
 0x4f4   : > { %v1221_v3 = vpop.permute.xlu1 %1220 }
 0x4f8   : > { %v1219_v5 = vpop.permute.xlu1 %1218 }
 0x4f9   : > { %v3404_v8 = vsel %vm1196_vm4, %v1217_v62, %v1219_v5  ;;  %v3407_v9 = vsel %vm1196_vm4, %v1219_v5, %v1221_v3 }
 0x4fa   : > { %v2956_v13 = vpack.i.bf16 %v3404_v8, %v3397_v63  ;;  %v3016_v46 = vpack.i.bf16 %v3407_v9, %v3404_v8 }
 0x4fc   : > { %v1223_v34 = vpop.permute.xlu1 %1222 }
 0x4fd   : > { %v3410_v10 = vsel %vm1196_vm4, %v1221_v3, %v1223_v34  ;;  %1249 = vst.msk [vmem:[#allocation3 + $0x40] sm:$0xff] %vm1196_vm4, %v1223_v34  ;;  %vm2638_vm4 = vmpackc.low %vm3464_vm12, %vm3515_vm0  ;;  %vm4019_vm12 = vcmask 515072  }
 0x4fe   : > { %v2991_v14 = vpack.i.bf16 %v3410_v10, %v3407_v9 }
 0x504   : > { %v1400_v11 = vld [vmem:[#allocation3 + $0x40] sm:$0xff] }
 0x505   : > { %1442 = vrot.lane.b32.xlu0 %v1400_v11, %s3077_s16  ;;  %1654 = vrot.lane.b32.xlu1 %v1400_v11, %s3078_s17  ;;  %v3021_v15 = vpack.i.bf16 %v1400_v11, %v3410_v10 }
 0x509   : > { %1526 = vrot.lane.b32.xlu0 %v1400_v11, %s3084_s27  ;;  %1484 = vrot.lane.b32.xlu1 %v1400_v11, %s3081_s22 }
 0x50d   : > { %2957 = vrot.lane.b32.xlu0 %v2956_v13, %s3078_s17  ;;  %2967 = vrot.lane.b32.xlu1 %v2956_v13, %s3081_s22 }
 0x511   : > { %2962 = vrot.lane.b32.xlu0 %v2956_v13, %s3077_s16  ;;  %2977 = vrot.lane.b32.xlu1 %v2956_v13, %s3083_s24 }
 0x515   : > { %2972 = vrot.lane.b32.xlu0 %v2956_v13, %s3084_s27  ;;  %2992 = vrot.lane.b32.xlu1 %v2991_v14, %s3077_s16 }
 0x519   : > { %2982 = vrot.lane.b32.xlu0 %v2956_v13, %s3090_s12  ;;  %3007 = vrot.lane.b32.xlu1 %v2991_v14, %s3083_s24 }
 0x51d   : > { %3012 = vrot.lane.b32.xlu1 %v2991_v14, %s3090_s12  ;;  %2987 = vrot.lane.b32.xlu0 %v2991_v14, %s3078_s17 }
 0x521   : > { %3017 = vrot.lane.b32.xlu1 %v3016_v46, %s3091_s13  ;;  %2997 = vrot.lane.b32.xlu0 %v2991_v14, %s3081_s22 }
 0x525   : > { %3022 = vrot.lane.b32.xlu1 %v3021_v15, %s3091_s13  ;;  %3002 = vrot.lane.b32.xlu0 %v2991_v14, %s3084_s27 }
 0x529   : > { %1607 = vrot.lane.b32.xlu1 %v3407_v9, %s3089_s10  ;;  %1688 = vrot.lane.b32.xlu0 %v1400_v11, %s3083_s24 }
 0x52b   : > { %v3444_v17 = vpop.permute.xlu1 %1595 }
 0x52d   : > { %1611 = vrot.lane.b32.xlu1 %v1400_v11, %s3089_s10  ;;  %1568 = vrot.lane.b32.xlu0 %v1400_v11, %s3090_s12 }
 0x52e   : > { %v2888_v47 = vpop.permute.xlu0 %2887 }
 0x52f   : > { %v2890_v20 = vunpack.i.h.bf16 %v2888_v47  ;;  %v2889_v22 = vunpack.i.l.bf16 %v2888_v47 }
 0x531   : > { %1605 = vrot.lane.b32.xlu0 %v3404_v8, %s3089_s10  ;;  %v1657_v7 = vsel %vm493_vm8, %v2889_v22, %v2890_v20 }
 0x532   : > { %v2628_v24 = vpack.c.bf16 %v1657_v7, %v3360_v56  ;;  %v2898_v25 = vpop.permute.xlu0 %2897  ;;  %v3462_v37 = vpop.permute.xlu1 %2892 }
 0x533   : > { %v2895_v27 = vunpack.i.h.bf16 %v3462_v37  ;;  %v2894_v30 = vunpack.i.l.bf16 %v3462_v37  ;;  %v2900_v16 = vunpack.i.h.bf16 %v2898_v25  ;;  %v2899_v31 = vunpack.i.l.bf16 %v2898_v25 }
 0x534   : > { %2630 = vmatprep.subr.msk.bf16.mxu1 %vm3457_vm11, %v2628_v24 }
 0x535   : > { %1609 = vrot.lane.b32.xlu0 %v3410_v10, %s3089_s10  ;;  %v3477_v33 = vsel %vm493_vm8, %v2890_v20, %v2895_v27  ;;  %v1656_v36 = vsel %vm493_vm8, %v2894_v30, %v2889_v22  ;;  %v1445_v4 = vsel %vm4018_vm9, %v2899_v31, %v2900_v16 }
 0x536   : > { %v2631_v39 = vpack.c.bf16 %v1656_v36, %v3362_v57  ;;  %v3488_v21 = vpop.permute.xlu0 %2907  ;;  %v2903_v40 = vpop.permute.xlu1 %2902 }
 0x537   : > { %v2910_v43 = vunpack.i.h.bf16 %v3488_v21  ;;  %v2905_v44 = vunpack.i.h.bf16 %v2903_v40  ;;  %v2904_v45 = vunpack.i.l.bf16 %v2903_v40  ;;  %v2909_v48 = vunpack.i.l.bf16 %v3488_v21 }
 0x538   : > { %2633 = vmatpush1.bf16.msk.msra.mxu1 %vm3483_vm13, %v2631_v39  ;;  %v1254_v21 = vadd.s32 768, %v3184_v6 }
 0x539   : > { %v3505_v1 = vsel %vm4018_vm9, %v2900_v16, %v2910_v43  ;;  %v1487_v49 = vsel %vm4024_vm1, %v2904_v45, %v2905_v44  ;;  %1743 = vperm.xlu0 %3026, %v3495_v42   ;;  %v1444_v54 = vsel %vm4018_vm9, %v2909_v48, %v2899_v31 }
 0x53a   : > { %v2634_v2 = vpack.c.bf16 %v1487_v49, %v1445_v4  ;;  %v2918_v50 = vpop.permute.xlu0 %2917  ;;  %v3513_v32 = vpop.permute.xlu1 %2912 }
 0x53b   : > { %v2915_v52 = vunpack.i.h.bf16 %v3513_v32  ;;  %v2914_v53 = vunpack.i.l.bf16 %v3513_v32  ;;  %v2920_v55 = vunpack.i.h.bf16 %v2918_v50  ;;  %v2919_v56 = vunpack.i.l.bf16 %v2918_v50 }
 0x53c   : > { %2636 = vmatprep.subr.msk.bf16.mxu1 %vm2635_vm15, %v2634_v2  ;;  %vm4023_vm15 = vcmask 506880   ;;  %v1255_v32 = vadd.s32 896, %v3184_v6 }
 0x53d   : > { %v1486_v29 = vsel %vm4024_vm1, %v2914_v53, %v2904_v45  ;;  %v3526_v57 = vsel %vm4024_vm1, %v2905_v44, %v2915_v52  ;;  %3027 = vset.pattern.permute.xlu0 %v3087_v12  ;;  %v1529_v13 = vsel %vm4020_vm3, %v2919_v56, %v2920_v55 }
 0x53e   : > { %v2637_v59 = vpack.c.bf16 %v1486_v29, %v1444_v54  ;;  %v2661_v60 = vpack.c.bf16 %v3526_v57, %v3505_v1  ;;  %v3535_v61 = vpop.permute.xlu0 %2927  ;;  %v2923_v62 = vpop.permute.xlu1 %2922 }
 0x53f   : > { %v2930_v3 = vunpack.i.h.bf16 %v3535_v61  ;;  %v2925_v5 = vunpack.i.h.bf16 %v2923_v62  ;;  %v2924_v34 = vunpack.i.l.bf16 %v2923_v62  ;;  %v2929_v11 = vunpack.i.l.bf16 %v3535_v61 }
 0x540   : > { %2639 = vmatpush1.bf16.msk.msra.mxu1 %vm2638_vm4, %v2637_v59  ;;  %v1302_v61 = vand.u32 31, %v1254_v21 }
 0x541   : > { %v3543_v12 = vsel %vm4020_vm3, %v2920_v55, %v2930_v3  ;;  %v1691_v14 = vsel %vm4022_vm2, %v2924_v34, %v2925_v5  ;;  %v1528_v19 = vsel %vm4020_vm3, %v2929_v11, %v2919_v56 }
 0x542   : > { %v2640_v46 = vpack.c.bf16 %v1529_v13, %v1691_v14  ;;  %v2938_v15 = vpop.permute.xlu0 %2937  ;;  %v3549_v28 = vpop.permute.xlu1 %2932 }
 0x543   : > { %v2935_v47 = vunpack.i.h.bf16 %v3549_v28  ;;  %v2934_v18 = vunpack.i.l.bf16 %v3549_v28  ;;  %v2940_v20 = vunpack.i.h.bf16 %v2938_v15  ;;  %v2939_v22 = vunpack.i.l.bf16 %v2938_v15 }
 0x544   : > { %2642 = vmatprep.subr.msk.bf16.mxu1 %vm2641_vm5, %v2640_v46 }
 0x545   : > { %v1690_v7 = vsel %vm4022_vm2, %v2934_v18, %v2924_v34  ;;  %v3558_v24 = vsel %vm4022_vm2, %v2925_v5, %v2935_v47  ;;  %v1572_v40 = vsel %vm4021_vm7, %v2939_v22, %v2940_v20  ;;  %v3602_v5 = vld [vmem:[%s4011_s2] sm:$0x7] }
 0x546   : > { %v2643_v25 = vpack.c.bf16 %v1528_v19, %v1690_v7  ;;  %v2667_v26 = vpack.c.bf16 %v3543_v12, %v3558_v24  ;;  %v3565_v30 = vpop.permute.xlu0 %2947  ;;  %v2943_v16 = vpop.permute.xlu1 %2942  ;;  %v1274_v19 = vand.u32 31, %v1250_v51 }
 0x547   : > { %v2950_v31 = vunpack.i.h.bf16 %v3565_v30  ;;  %v2945_v36 = vunpack.i.h.bf16 %v2943_v16  ;;  %v2944_v39 = vunpack.i.l.bf16 %v2943_v16  ;;  %v2949_v44 = vunpack.i.l.bf16 %v3565_v30 }
 0x548   : > { %2645 = vmatpush1.bf16.msk.msra.mxu1 %vm2644_vm6, %v2643_v25  ;;  %vm3670_vm6 = vcmp.le.s32.totalorder %v1274_v19, 30 }
 0x549   : > { %v3573_v45 = vsel %vm4021_vm7, %v2940_v20, %v2950_v31  ;;  %v1726_v48 = vsel %vm4019_vm12, %v2944_v39, %v2945_v36  ;;  %v1571_v53 = vsel %vm4021_vm7, %v2949_v44, %v2939_v22 }
 0x54a   : > { %v2646_v4 = vpack.c.bf16 %v1726_v48, %v1572_v40  ;;  %v3576_v49 = vpop.permute.xlu1 %2952  ;;  %v1598_v56 = vpop.permute.xlu0 %1597 }
 0x54b   : > { %v2955_v2 = vunpack.i.h.bf16 %v3576_v49  ;;  %v2954_v50 = vunpack.i.l.bf16 %v3576_v49  ;;  %v1614_v34 = vsel %vm4023_vm15, %v3444_v17, %v1598_v56  ;;  %v1251_v17 = vadd.s32 384, %v3184_v6 }
 0x54c   : > { %2648 = vmatprep.subr.msk.bf16.mxu1 %vm3457_vm11, %v2646_v4  ;;  %vm4017_vm11 = vcmask 588800  }
 0x54d   : > { %v1725_v54 = vsel %vm4019_vm12, %v2954_v50, %v2944_v39  ;;  %v3587_v55 = vsel %vm4019_vm12, %v2945_v36, %v2955_v2  ;;  %v1281_v18 = vand.u32 31, %v1251_v17  ;;  %v2655_v50 = vpack.c.bf16 %v3477_v33, %v3365_v58 }
 0x54e   : > { %v2649_v29 = vpack.c.bf16 %v1725_v54, %v1571_v53  ;;  %v2673_v59 = vpack.c.bf16 %v3587_v55, %v3573_v45  ;;  %v3591_v62 = vpop.permute.xlu1 %1599  ;;  %v1253_v54 = vadd.s32 640, %v3184_v6 }
 0x54f   : > { %v1615_v23 = vsel %vm4023_vm15, %v1598_v56, %v3591_v62  ;;  %vm3663_vm5 = vcmp.le.s32.totalorder %v1281_v18, 30  ;;  %v1252_v56 = vadd.s32 512, %v3184_v6  ;;  %v1309_v6 = vand.u32 31, %v1255_v32 }
 0x550   : > { %2651 = vmatpush1.bf16.msk.msra.mxu1 %vm3483_vm13, %v2649_v29  ;;  %vm3631_vm13 = vcmp.ge.s32.totalorder %v1281_v18, 1  ;;  %v1295_v17 = vand.u32 31, %v1253_v54  ;;  %v4081_v32 = vmov 0 }
 0x551   : > { %2277 = vmatprep.subr.msk.mxu1 %vm3490_vm14, %v1615_v23  ;;  %vm3636_vm14 = vcmp.ge.s32.totalorder %v1274_v19, 1  ;;  %v1288_v51 = vand.u32 31, %v1252_v56 }
 0x552   : > { %v3611_v38 = vpop.permute.xlu1 %1601  ;;  %vm3659_vm4 = vmpackc.low %vm4026_vm10, %vm3636_vm14 }
 0x554   : > { %2278 = vmatpush1.msk.msra.mxu1 %vm3515_vm0, %v1614_v34  ;;  %vm3647_vm0 = vmpackc.low %vm4026_vm10, %vm3631_vm13 }
 0x555   : > { %2279 = vmatmul.mubr.msk.f32.vlgmr.msra.gmra.mrb[4].mxu1 %vm4017_vm11, %v3602_v5  ;;  %vm2659_vm11 = vmpackc.low %vm3631_vm13, %vm3663_vm5 }
 0x556   : > { %1885 = vmatprep.mubr.f32.mxu1 %v3075_v0  ;;  %vm2668_vm13 = vmpackc.low %vm3670_vm6, %vm4026_vm10 }
 0x564   : > { %v3613_v41 = vpop.permute.xlu0 %1603  ;;  %v3615_v11 = vpop.permute.xlu1 %1714 }
 0x565   : > { %v1617_v21 = vsel %vm4023_vm15, %v3611_v38, %v3613_v41 }
 0x577   : > { %v3617_v13 = vpop.permute.xlu0 %1442  ;;  %v3619_v14 = vpop.permute.xlu1 %1654 }
 0x57b   : > { %v3623_v46 = vpop.permute.xlu0 %1526  ;;  %v3625_v15 = vpop.permute.xlu1 %1484 }
 0x57f   : > { %v3627_v20 = vpop.permute.xlu0 %2957  ;;  %v3629_v22 = vpop.permute.xlu1 %2967 }
 0x580   : > { %v2959_v25 = vunpack.i.l.bf16 %v3627_v20  ;;  %v2969_v39 = vunpack.i.l.bf16 %v3629_v22 }
 0x582   : > { %v1659_v36 = vsel %vm493_vm8, %v2895_v27, %v2959_v25  ;;  %v1489_v29 = vsel %vm4024_vm1, %v2915_v52, %v2969_v39 }
 0x583   : > { %v2652_v44 = vpack.c.bf16 %v1659_v36, %v3373_v35  ;;  %v3652_v48 = vpop.permute.xlu0 %2962  ;;  %v3654_v4 = vpop.permute.xlu1 %2977  ;;  %v2970_v36 = vunpack.i.h.bf16 %v3629_v22 }
 0x584   : > { %v2964_v35 = vunpack.i.l.bf16 %v3652_v48  ;;  %v2979_v33 = vunpack.i.l.bf16 %v3654_v4  ;;  %v2965_v24 = vunpack.i.h.bf16 %v3652_v48 }
 0x585   : > { %2654 = vmatprep.subr.msk.bf16.mxu1 %vm3647_vm0, %v2652_v44  ;;  %v3793_v40 = vsel %vm4024_vm1, %v2969_v39, %v2970_v36 }
 0x586   : > { %v1447_v58 = vsel %vm4018_vm9, %v2910_v43, %v2964_v35  ;;  %2657 = vmatpush1.bf16.msk.msra.mxu1 %vm3659_vm4, %v2655_v50  ;;  %vm2662_vm9 = vmpackc.low %vm3636_vm14, %vm3670_vm6  ;;  %v1693_v18 = vsel %vm4022_vm2, %v2935_v47, %v2979_v33  ;;  %vm3735_vm14 = vcmp.ge.s32.totalorder %v1288_v51, 1  ;;  %v1728_v47 = vsel %vm4019_vm12, %v2955_v2, %v3615_v11 }
 0x587   : > { %v2658_v23 = vpack.c.bf16 %v1489_v29, %v1447_v58  ;;  %v3696_v52 = vpop.permute.xlu0 %2972  ;;  %v3698_v34 = vpop.permute.xlu1 %2992  ;;  %vm3758_vm12 = vcmp.ge.s32.totalorder %v1302_v61, 1  ;;  %vm3780_vm2 = vcmp.le.s32.totalorder %v1302_v61, 30 }
 0x588   : > { %v2974_v43 = vunpack.i.l.bf16 %v3696_v52  ;;  %v2995_v29 = vunpack.i.h.bf16 %v3698_v34  ;;  %v2994_v58 = vunpack.i.l.bf16 %v3698_v34 }
 0x589   : > { %2660 = vmatprep.subr.msk.bf16.mxu1 %vm2659_vm11, %v2658_v23  ;;  %vm2665_vm11 = vmpackc.low %vm3663_vm5, %vm4026_vm10  ;;  %v4083_v23 = vmov 0 }
 0x58a   : > { %v1531_v19 = vsel %vm4020_vm3, %v2930_v3, %v2974_v43  ;;  %2663 = vmatpush1.bf16.msk.msra.mxu1 %vm2662_vm9, %v2661_v60  ;;  %v2960_v3 = vunpack.i.h.bf16 %v3627_v20  ;;  %vm3731_vm9 = vcmp.ge.s32.totalorder %v1295_v17, 1  ;;  %vm3762_vm3 = vcmp.le.s32.totalorder %v1295_v17, 30 }
 0x58b   : > { %v2664_v7 = vpack.c.bf16 %v1531_v19, %v1693_v18  ;;  %v3722_v16 = vpop.permute.xlu0 %2982  ;;  %v3724_v28 = vpop.permute.xlu1 %3007  ;;  %v4084_v23 = vsel %vm3780_vm2, 4294967295, %v4083_v23  ;;  %v4094_v19 = vmov 0  ;;  %vm4096_vm2 = vcmask 785408  }
 0x58c   : > { %v2984_v1 = vunpack.i.l.bf16 %v3722_v16  ;;  %v1660_v12 = vsel %vm493_vm8, %v2959_v25, %v2960_v3  ;;  %v1616_v25 = vsel %vm4023_vm15, %v3591_v62, %v3611_v38  ;;  %vm4089_vm15 = vcmask 1031168  }
 0x58d   : > { %2666 = vmatprep.subr.msk.bf16.mxu1 %vm2665_vm11, %v2664_v7  ;;  %vm3752_vm11 = vcmp.ge.s32.totalorder %v1309_v6, 1  ;;  %v2679_v38 = vpack.c.bf16 %v1660_v12, %v3397_v63  ;;  %v1448_v63 = vsel %vm4089_vm15, %v2964_v35, %v2965_v24  ;;  %v3009_v35 = vunpack.i.l.bf16 %v3724_v28 }
 0x58e   : > { %v1574_v20 = vsel %vm4021_vm7, %v2950_v31, %v2984_v1  ;;  %2669 = vmatpush1.bf16.msk.msra.mxu1 %vm2668_vm13, %v2667_v26  ;;  %vm3766_vm7 = vcmp.le.s32.totalorder %v1309_v6, 30  ;;  %vm3776_vm13 = vcmp.le.s32.totalorder %v1288_v51, 30  ;;  %v2975_v51 = vunpack.i.h.bf16 %v3696_v52 }
 0x58f   : > { %v2670_v50 = vpack.c.bf16 %v1728_v47, %v1574_v20  ;;  %v2988_v49 = vpop.permute.xlu0 %2987  ;;  %v3756_v54 = vpop.permute.xlu1 %3012  ;;  %v4082_v32 = vsel %vm3776_vm13, 4294967295, %v4081_v32  ;;  %v2985_v52 = vunpack.i.h.bf16 %v3722_v16 }
 0x590   : > { %v2990_v26 = vunpack.i.h.bf16 %v2988_v49  ;;  %v2989_v56 = vunpack.i.l.bf16 %v2988_v49 }
 0x591   : > { %2672 = vmatprep.subr.msk.bf16.mxu1 %vm3647_vm0, %v2670_v50  ;;  %vm3804_vm0 = vmpackc.low %vm4026_vm10, %vm3731_vm9 }
 0x592   : > { %v1661_v34 = vsel %vm493_vm8, %v2960_v3, %v2989_v56  ;;  %2675 = vmatpush1.bf16.msk.msra.mxu1 %vm3659_vm4, %v2673_v59  ;;  %v1662_v22 = vsel %vm493_vm8, %v2989_v56, %v2990_v26  ;;  %v1663_v39 = vsel %vm493_vm8, %v2990_v26, %v3619_v14  ;;  %vm3820_vm4 = vmpackc.low %vm4026_vm10, %vm3735_vm14  ;;  %v2980_v14 = vunpack.i.h.bf16 %v3654_v4 }
 0x593   : > { %v2676_v17 = vpack.c.bf16 %v1661_v34, %v3404_v8  ;;  %v2998_v45 = vpop.permute.xlu0 %2997  ;;  %v3813_v55 = vpop.permute.xlu1 %3017  ;;  %2290 = vmatprep.subr.msk.mxu1 %vm3663_vm5, %v1617_v21  ;;  %vm3831_vm8 = vmpackc.low %vm4026_vm10, %vm3752_vm11  ;;  %v2700_v6 = vpack.c.bf16 %v1663_v39, %v3410_v10  ;;  %v2703_v7 = vpack.c.bf16 %v1662_v22, %v3407_v9  ;;  %v2685_v4 = vpack.c.bf16 %v3793_v40, %v1448_v63 }
 0x594   : > { %v3000_v8 = vunpack.i.h.bf16 %v2998_v45  ;;  %v2999_v37 = vunpack.i.l.bf16 %v2998_v45  ;;  %vm4092_vm5 = vmmov %vm4089_vm15  ;;  %v3020_v20 = vunpack.i.h.bf16 %v3813_v55  ;;  %v3019_v10 = vunpack.i.l.bf16 %v3813_v55 }
 0x595   : > { %v1451_v18 = vsel %vm4092_vm5, %v2995_v29, %v3617_v13  ;;  %vm4093_vm1 = vmmov %vm4092_vm5  ;;  %2678 = vmatprep.subr.msk.bf16.mxu0 %vm3804_vm0, %v2676_v17  ;;  %v3015_v17 = vunpack.i.h.bf16 %v3756_v54 }
 0x596   : > { %v1449_v48 = vsel %vm4093_vm1, %v2965_v24, %v2994_v58  ;;  %vm3845_vm15 = vmpackc.low %vm4026_vm10, %vm3758_vm12  ;;  %v1491_v13 = vsel %vm4096_vm2, %v2970_v36, %v2999_v37  ;;  %2291 = vmatpush1.msk.msra.mxu1 %vm3670_vm6, %v1616_v25  ;;  %2681 = vmatpush1.bf16.msk.msra.mxu0 %vm3820_vm4, %v2679_v38  ;;  %vm4098_vm6 = vcmask 777216   ;;  %vm4099_vm10 = vcmask 588800  }
 0x597   : > { %v4095_v19 = vsel %vm3845_vm15, 4294967295, %v4094_v19  ;;  %vm4097_vm1 = vmmov %vm4096_vm2  ;;  %v2682_v3 = vpack.c.bf16 %v1491_v13, %v1449_v48  ;;  %v3003_v9 = vpop.permute.xlu0 %3002  ;;  %v3023_v49 = vpop.permute.xlu1 %3022  ;;  %2292 = vmatmul.mubr.msk.f32.vlgmr.msra.gmra.mrb[6].mxu1 %vm4099_vm10, %v3602_v5  ;;  %2702 = vmatprep.subr.msk.bf16.mxu1 %vm3831_vm8, %v2700_v6  ;;  %v3014_v24 = vunpack.i.l.bf16 %v3756_v54  ;;  %vm4102_vm10 = vnez %v4084_v23 }
 0x598   : > { %v1493_v61 = vsel %vm4097_vm1, %v3000_v8, %v3625_v15  ;;  %vm2683_vm5 = vmpackc.low %vm3731_vm9, %vm3762_vm3  ;;  %v1694_v15 = vsel %vm4098_vm6, %v2979_v33, %v2980_v14  ;;  %v1492_v53 = vsel %vm4097_vm1, %v2999_v37, %v3000_v8  ;;  %v3005_v36 = vunpack.i.h.bf16 %v3003_v9  ;;  %2705 = vmatpush1.bf16.msk.msra.mxu1 %vm3845_vm15, %v2703_v7  ;;  %2027 = vmatprep.mubr.f32.mxu1 %v3075_v0 }
 0x599   : > { %v2706_v47 = vpack.c.bf16 %v1493_v61, %v1451_v18  ;;  %v3004_v50 = vunpack.i.l.bf16 %v3003_v9  ;;  %vm4100_vm6 = vcmask 769024   ;;  %vm4101_vm1 = vcmask 1031168   ;;  %2684 = vmatprep.subr.msk.bf16.mxu0 %vm2683_vm5, %v2682_v3  ;;  %vm4105_vm15 = vmpackc.low %vm3752_vm11, %vm3766_vm7 }
 0x59a   : > { %v1532_v33 = vsel %vm4100_vm6, %v2974_v43, %v2975_v51  ;;  %v1450_v12 = vsel %vm4101_vm1, %v2994_v58, %v2995_v29  ;;  %v3010_v43 = vunpack.i.h.bf16 %v3724_v28  ;;  %vm4103_vm6 = vcmask 777216   ;;  %vm4110_vm11 = vmpackc.low %vm3735_vm14, %vm3776_vm13 }
 0x59b   : > { %v1695_v26 = vsel %vm4103_vm6, %v2980_v14, %v3009_v35  ;;  %vm4104_vm1 = vcmask 769024   ;;  %2708 = vmatprep.subr.msk.bf16.mxu1 %vm4105_vm15, %v2706_v47  ;;  %vm4106_vm9 = vmmov 1   ;;  %v2709_v28 = vpack.c.bf16 %v1492_v53, %v1450_v12  ;;  %2687 = vmatpush1.bf16.msk.msra.mxu0 %vm4110_vm11, %v2685_v4  ;;  %v1689_v44 = vpop.permute.xlu0 %1688 }
 0x59c   : > { %v1533_v56 = vsel %vm4104_vm1, %v2975_v51, %v3004_v50  ;;  %vm3909_vm5 = vmpackc.low %vm3762_vm3, %vm4106_vm9  ;;  %vm4109_vm2 = vcmask 515072   ;;  %v3025_v25 = vunpack.i.h.bf16 %v3023_v49  ;;  %v3024_v40 = vunpack.i.l.bf16 %v3023_v49  ;;  %v1608_v51 = vpop.permute.xlu1 %1607 }
 0x59d   : > { %v1730_v29 = vsel %vm4109_vm2, %v3019_v10, %v3020_v20  ;;  %v2688_v58 = vpack.c.bf16 %v1533_v56, %v1695_v26  ;;  %vm3923_vm15 = vmpackc.low %vm3776_vm13, %vm4106_vm9  ;;  %v2691_v38 = vpack.c.bf16 %v1532_v33, %v1694_v15  ;;  %vm4116_vm11 = vcmask 523264  }
 0x59e   : > { %vm4113_vm6 = vmmov %vm4104_vm1  ;;  %v1576_v22 = vsel %vm4116_vm11, %v2985_v52, %v3014_v24 }
 0x59f   : > { %v1534_v0 = vsel %vm4113_vm6, %v3004_v50, %v3005_v36  ;;  %vm4114_vm2 = vmmov %vm4104_vm1  ;;  %vm4115_vm1 = vcmask 777216   ;;  %2690 = vmatprep.subr.msk.bf16.mxu0 %vm3909_vm5, %v2688_v58  ;;  %v2694_v55 = vpack.c.bf16 %v1730_v29, %v1576_v22  ;;  %v1569_v63 = vpop.permute.xlu0 %1568 }
 0x5a0   : > { %v1535_v34 = vsel %vm4114_vm2, %v3005_v36, %v3623_v46  ;;  %v1697_v60 = vsel %vm4115_vm1, %v3010_v43, %v1689_v44  ;;  %vm2713_vm14 = vmpackc.low %vm3766_vm7, %vm4106_vm9  ;;  %vm4119_vm2 = vcmask 515072   ;;  %2693 = vmatpush1.bf16.msk.msra.mxu0 %vm3923_vm15, %v2691_v38  ;;  %vm4125_vm15 = vcmask 506880   ;;  %v1612_v6 = vpop.permute.xlu1 %1611 }
 0x5a1   : > { %v2712_v39 = vpack.c.bf16 %v1535_v34, %v1697_v60  ;;  %vm4117_vm13 = vmpackc.low %vm3758_vm12, %vm4102_vm10  ;;  %v1729_v45 = vsel %vm4119_vm2, %v3615_v11, %v3019_v10  ;;  %2696 = vmatprep.subr.msk.bf16.mxu0 %vm3804_vm0, %v2694_v55  ;;  %vm4127_vm0 = vnez %v4095_v19 }
 0x5a2   : > { %2711 = vmatpush1.bf16.msk.msra.mxu1 %vm4117_vm13, %v2709_v28  ;;  %vm4118_vm6 = vmmov %vm4115_vm1 }
 0x5a3   : > { %v1696_v46 = vsel %vm4118_vm6, %v3009_v35, %v3010_v43  ;;  %vm2716_vm1 = vmpackc.low %vm4102_vm10, %vm4106_vm9  ;;  %2714 = vmatprep.subr.msk.bf16.mxu1 %vm2713_vm14, %v2712_v39  ;;  %v1606_v16 = vpop.permute.xlu0 %1605  ;;  %vm4128_vm6 = vnez %v4082_v32 }
 0x5a4   : > { %v2715_v2 = vpack.c.bf16 %v1534_v0, %v1696_v46  ;;  %vm4120_vm12 = vmmov %vm4116_vm11 }
 0x5a5   : > { %v1575_v14 = vsel %vm4120_vm12, %v2984_v1, %v2985_v52  ;;  %vm4121_vm13 = vmmov %vm4119_vm2  ;;  %v1618_v1 = vsel %vm4125_vm15, %v3613_v41, %v1606_v16 }
 0x5a6   : > { %v1731_v54 = vsel %vm4121_vm13, %v3020_v20, %v3024_v40  ;;  %vm4122_vm5 = vmmov %vm4116_vm11  ;;  %v2697_v37 = vpack.c.bf16 %v1729_v45, %v1575_v14  ;;  %2717 = vmatpush1.bf16.msk.msra.mxu1 %vm2716_vm1, %v2715_v2  ;;  %vm2034_vm1 = vcmask 1042432  }
 0x5a7   : > { %v1578_v8 = vsel %vm4122_vm5, %v3015_v17, %v1569_v63  ;;  %vm4123_vm11 = vmmov %vm4119_vm2  ;;  %v1610_v59 = vpop.permute.xlu0 %1609 }
 0x5a8   : > { %v1732_v11 = vsel %vm4123_vm11, %v3024_v40, %v3025_v25  ;;  %vm4124_vm9 = vmmov %vm4122_vm5  ;;  %2699 = vmatpush1.bf16.msk.msra.mxu0 %vm3820_vm4, %v2697_v37 }
 0x5a9   : > { %v2718_v18 = vpack.c.bf16 %v1732_v11, %v1578_v8  ;;  %v1577_v48 = vsel %vm4124_vm9, %v3014_v24, %v3015_v17  ;;  %vm4126_vm14 = vmmov %vm4125_vm15 }
 0x5aa   : > { %v2721_v35 = vpack.c.bf16 %v1731_v54, %v1577_v48  ;;  %v1619_v62 = vsel %vm4126_vm14, %v1606_v16, %v1608_v51  ;;  %vm4129_vm4 = vmmov %vm4126_vm14 }
 0x5ab   : > { %2720 = vmatprep.subr.msk.bf16.mxu1 %vm3831_vm8, %v2718_v18  ;;  %2303 = vmatprep.subr.msk.mxu0 %vm3762_vm3, %v1619_v62  ;;  %v1620_v7 = vsel %vm4129_vm4, %v1608_v51, %v1610_v59  ;;  %vm4130_vm2 = vmmov %vm4129_vm4  ;;  %vm4131_vm8 = vcmask 588800  }
 0x5ac   : > { %2723 = vmatpush1.bf16.msk.msra.mxu1 %vm4127_vm0, %v2721_v35  ;;  %2304 = vmatpush1.msk.msra.mxu0 %vm4128_vm6, %v1618_v1  ;;  %v1621_v27 = vsel %vm4130_vm2, %v1610_v59, %v1612_v6  ;;  %vm4132_vm3 = vmmov %vm4131_vm8 }
 0x5ad   : > { %2305 = vmatmul.mubr.msk.f32.vlgmr.msra.gmra.mrb[6].mxu0 %vm4131_vm8, %v3602_v5  ;;  %2316 = vmatprep.subr.msk.mxu1 %vm3766_vm7, %v1621_v27 }
 0x5b0   : > { %2317 = vmatpush1.msk.msra.mxu1 %vm4102_vm10, %v1620_v7 }
 0x5b1   : > { %2318 = vmatmul.mubr.msk.f32.vlgmr.msra.gmra.mrb[8].mxu1 %vm4132_vm3, %v3602_v5 }
 0x5b8   : > { %v1744_v13 = vpop.permute.xlu0 %1743 }
 0x628   : > { %v1816_v41 = vpop.f32.mrb[4].mxu1 }
 0x629   : > { %v1818_v30 = vpop.f32.mrb[5].mxu1  ;;  %v1817_v61 = vadd.f32 %v1816_v41, %v1744_v13 }
 0x62a   : > { %v1819_v3 = vadd.f32 %v1818_v30, %v1744_v13 }
 0x62b   : > { %v2035_v20 = vsel %vm2034_vm1, %v1817_v61, 0.0 }
 0x62c   : > { %v2036_v31 = vsel %vm2034_vm1, %v1819_v3, 0.0 }
 0x62d   : > { %v2037_v9 = vadd.f32 %v2036_v31, %v2035_v20 }
 0x66a   : > { %v1887_v32 = vpop.f32.mrb[6].mxu1 }
 0x66b   : > { %v1889_v19 = vpop.f32.mrb[7].mxu1  ;;  %v1888_v47 = vadd.f32 %v1887_v32, %v1744_v13 }
 0x66c   : > { %v1890_v23 = vadd.f32 %v1889_v19, %v1744_v13 }
 0x66d   : > { %v2038_v10 = vsel %vm2034_vm1, %v1888_v47, 0.0 }
 0x66e   : > { %v2039_v15 = vadd.f32 %v2038_v10, %v2037_v9  ;;  %v2040_v5 = vsel %vm2034_vm1, %v1890_v23, 0.0 }
 0x670   : > { %v2041_v49 = vadd.f32 %v2040_v5, %v2039_v15 }
 0x680   : > { %v1958_v53 = vpop.f32.mrb[6].mxu0 }
 0x681   : > { %v1959_v36 = vadd.f32 %v1958_v53, %v1744_v13  ;;  %v1960_v50 = vpop.f32.mrb[7].mxu0 }
 0x682   : > { %v1961_v4 = vadd.f32 %v1960_v50, %v1744_v13 }
 0x683   : > { %v2042_v33 = vsel %vm2034_vm1, %v1959_v36, 0.0 }
 0x684   : > { %v2029_v12 = vpop.f32.mrb[8].mxu1  ;;  %v2043_v24 = vadd.f32 %v2042_v33, %v2041_v49  ;;  %v2044_v52 = vsel %vm2034_vm1, %v1961_v4, 0.0 }
 0x685   : > { %v2030_v43 = vadd.f32 %v2029_v12, %v1744_v13  ;;  %v2031_v26 = vpop.f32.mrb[9].mxu1 }
 0x686   : > { %v2032_v56 = vadd.f32 %v2031_v26, %v1744_v13  ;;  %v2045_v57 = vadd.f32 %v2044_v52, %v2043_v24 }
 0x687   : > { %v2046_v28 = vsel %vm2034_vm1, %v2030_v43, 0.0 }
 0x688   : > { %v2048_v29 = vsel %vm2034_vm1, %v2032_v56, 0.0  ;;  %v2047_v58 = vadd.f32 %v2046_v28, %v2045_v57 }
 0x68a   : > { %v2049_v25 = vadd.f32 %v2048_v29, %v2047_v58 }
 0x68c   : > { %2050 = vadd.xlane.f32.xlu1 %v2049_v25 }
 0x69d   : > { %2099 = vperm.xlu1 %2884, %v3495_v42  }
 0x719   : > { %v2051_v44 = vpop.xlane.xlu1 %2050 }
 0x71a   : > { %v2053_v21 = vmul.f32 0.0009765625, %v2051_v44 }
 0x71c   : > { %v2054_v0 = vsub.f32 %v1817_v61, %v2053_v21  ;;  %v2055_v40 = vsub.f32 %v1819_v3, %v2053_v21  ;;  %v2056_v34 = vsub.f32 %v1888_v47, %v2053_v21  ;;  %v2057_v60 = vsub.f32 %v1890_v23, %v2053_v21 }
 0x71d   : > { %v2058_v38 = vsub.f32 %v1959_v36, %v2053_v21  ;;  %v2059_v17 = vsub.f32 %v1961_v4, %v2053_v21  ;;  %v2060_v14 = vsub.f32 %v2030_v43, %v2053_v21  ;;  %v2061_v37 = vsub.f32 %v2032_v56, %v2053_v21  ;;  %v2100_v10 = vpop.permute.xlu1 %2099 }
 0x71e   : > { %v2062_v22 = vmul.f32 %v2054_v0, %v2054_v0  ;;  %v2063_v39 = vmul.f32 %v2055_v40, %v2055_v40  ;;  %v2064_v46 = vmul.f32 %v2056_v34, %v2056_v34  ;;  %v2065_v45 = vmul.f32 %v2057_v60, %v2057_v60 }
 0x71f   : > { %v2066_v54 = vmul.f32 %v2058_v38, %v2058_v38  ;;  %v2067_v51 = vmul.f32 %v2059_v17, %v2059_v17  ;;  %v2068_v35 = vmul.f32 %v2060_v14, %v2060_v14  ;;  %v2069_v62 = vmul.f32 %v2061_v37, %v2061_v37 }
 0x720   : > { %v2070_v55 = vsel %vm2034_vm1, %v2062_v22, 0.0  ;;  %v2071_v2 = vsel %vm2034_vm1, %v2063_v39, 0.0  ;;  %v2073_v8 = vsel %vm2034_vm1, %v2064_v46, 0.0  ;;  %v2075_v18 = vsel %vm2034_vm1, %v2065_v45, 0.0 }
 0x721   : > { %v2072_v63 = vadd.f32 %v2071_v2, %v2070_v55  ;;  %v2077_v16 = vsel %vm2034_vm1, %v2066_v54, 0.0  ;;  %v2079_v6 = vsel %vm2034_vm1, %v2067_v51, 0.0  ;;  %v2081_v7 = vsel %vm2034_vm1, %v2068_v35, 0.0 }
 0x722   : > { %v2083_v41 = vsel %vm2034_vm1, %v2069_v62, 0.0 }
 0x723   : > { %v2074_v11 = vadd.f32 %v2073_v8, %v2072_v63 }
 0x725   : > { %v2076_v48 = vadd.f32 %v2075_v18, %v2074_v11 }
 0x727   : > { %v2078_v1 = vadd.f32 %v2077_v16, %v2076_v48 }
 0x729   : > { %v2080_v59 = vadd.f32 %v2079_v6, %v2078_v1 }
 0x72b   : > { %v2082_v27 = vadd.f32 %v2081_v7, %v2080_v59 }
 0x72d   : > { %v2084_v30 = vadd.f32 %v2083_v41, %v2082_v27 }
 0x72f   : > { %2085 = vadd.xlane.f32.xlu0 %v2084_v30 }
 0x745   : > { %2111 = vperm.xlu0 %3027, %v3495_v42  }
 0x7bc   : > { %v2086_v32 = vpop.xlane.xlu0 %2085 }
 0x7bd   : > { %v2087_v19 = vmul.f32 0.0009765625, %v2086_v32 }
 0x7bf   : > { %v2088_v13 = vadd.f32 1e-05, %v2087_v19 }
 0x7c1   : > { %3030 = vrsqrt.f32 %v2088_v13 }
 0x7c4   : > { %v2112_v53 = vpop.permute.xlu0 %2111 }
 0x7cb   : > { %v3031_v61 = vpop.eup %3030 }
 0x7cc   : > { %v2090_v3 = vmul.f32 %v3031_v61, %v2054_v0  ;;  %v2091_v47 = vmul.f32 %v3031_v61, %v2055_v40  ;;  %v2092_v20 = vmul.f32 %v3031_v61, %v2056_v34  ;;  %v2093_v31 = vmul.f32 %v3031_v61, %v2057_v60 }
 0x7cd   : > { %v2094_v23 = vmul.f32 %v3031_v61, %v2058_v38  ;;  %v2095_v9 = vmul.f32 %v3031_v61, %v2059_v17  ;;  %v2096_v15 = vmul.f32 %v3031_v61, %v2060_v14  ;;  %v2097_v5 = vmul.f32 %v3031_v61, %v2061_v37 }
 0x7ce   : > { %v2102_v36 = vmul.f32 %v2100_v10, %v2090_v3  ;;  %v2103_v50 = vmul.f32 %v2100_v10, %v2091_v47  ;;  %v2104_v49 = vmul.f32 %v2100_v10, %v2092_v20  ;;  %v2105_v4 = vmul.f32 %v2100_v10, %v2093_v31 }
 0x7cf   : > { %v2106_v42 = vmul.f32 %v2100_v10, %v2094_v23  ;;  %v2107_v33 = vmul.f32 %v2100_v10, %v2095_v9  ;;  %v2108_v12 = vmul.f32 %v2100_v10, %v2096_v15  ;;  %v2109_v24 = vmul.f32 %v2100_v10, %v2097_v5 }
 0x7d0   : > { %v2114_v52 = vadd.f32 %v2112_v53, %v2102_v36  ;;  %v2115_v43 = vadd.f32 %v2112_v53, %v2103_v50  ;;  %v2116_v26 = vadd.f32 %v2112_v53, %v2104_v49  ;;  %v2117_v56 = vadd.f32 %v2112_v53, %v2105_v4 }
 0x7d1   : > { %v2118_v57 = vadd.f32 %v2112_v53, %v2106_v42  ;;  %v2119_v28 = vadd.f32 %v2112_v53, %v2107_v33  ;;  %v2120_v29 = vadd.f32 %v2112_v53, %v2108_v12  ;;  %v2121_v58 = vadd.f32 %v2112_v53, %v2109_v24 }
 0x7d2   : > { %v2122_v25 = vmax.f32 %v2114_v52, 0.0  ;;  %v2123_v44 = vmax.f32 %v2115_v43, 0.0  ;;  %v2124_v21 = vmax.f32 %v2116_v26, 0.0  ;;  %v2125_v0 = vmax.f32 %v2117_v56, 0.0 }
 0x7d3   : > { %v2126_v40 = vmax.f32 %v2118_v57, 0.0  ;;  %v2127_v34 = vmax.f32 %v2119_v28, 0.0  ;;  %v2128_v60 = vmax.f32 %v2120_v29, 0.0  ;;  %v2129_v38 = vmax.f32 %v2121_v58, 0.0 }
 0x7d4   : > { %v2138_v22 = vcombine.low %v2122_v25, %v2123_v44  ;;  %v2139_v39 = vcombine.low %v2124_v21, %v2125_v0 }
 0x7d5   : > { %v2140_v46 = vcombine.low %v2126_v40, %v2127_v34  ;;  %v2141_v17 = vcombine.low %v2128_v60, %v2129_v38 }
 0x7d6   : > { %2146 = vst [vmem:[%s259_s20] sm:$0x77] %v2138_v22  ;;  %2147 = vst [vmem:[%s259_s20 + $0x8] sm:$0x77] %v2139_v39 }
 0x7d7   : > { %2148 = vst [vmem:[%s259_s20 + $0x10] sm:$0x77] %v2140_v46  ;;  %2149 = vst [vmem:[%s259_s20 + $0x18] sm:$0x77] %v2141_v17 }
 0x7d8 PF: > { %s16_s18 = sadd.s32 1, %s3070_s18  }
 0x7d9   : > { %p13_p3 = scmp.ge.s32.totalorder %s16_s18, 4  }
 0x7db   :  { %15 = sbr.rel (!%p13_p3) target bundleno = 1 (0x1), region = 78 }
 0x7e2   :  { %2171 = vsyncpa [#allocation5], 1 }
 0x7e3   :  { %2173 = vsyncpa [#allocation5 + $0x1], 1 }

</bundles_post_ra>
